<compile_context>
chip_gen: v7x
topology: tpu7x:2x2x1
jax: 0.10.0
libtpu: 0.0.40
codegen_flags: <defaults>
</compile_context>

<pallas_src>
import functools
import math

import jax
import jax.numpy as jnp
from jax import lax
from jax.experimental import pallas as pl
from jax.experimental.pallas import tpu as pltpu

PROJ_DIM = 256
VIDEO_EMB = 400
TEXT_EMB = 768
LN_EPS = 1e-5
COS_EPS = 1e-6
INV_SQRT2 = 1.0 / math.sqrt(2.0)
MAX_BATCH_TILE = 512


def _round_up(x, m):
    return ((x + m - 1) // m) * m


def _projection_head(x_bf16, wp, bp, wf, bf, gamma, beta):
    """ProjectionHead.forward (dropout = identity / eval mode).

    Matmul operands are bf16 (MXU) with f32 accumulation; GELU (exact erf)
    and LayerNorm math are f32.  LayerNorm uses one-pass var = E[x^2]-mean^2."""
    projected = jnp.dot(x_bf16, wp, preferred_element_type=jnp.float32) + bp
    # nn.GELU() default: exact erf formulation.
    h = 0.5 * projected * (1.0 + lax.erf(projected * INV_SQRT2))
    h = jnp.dot(h.astype(wf.dtype), wf, preferred_element_type=jnp.float32) + bf
    h = h + projected
    mean = jnp.mean(h, axis=-1, keepdims=True)
    meansq = jnp.mean(h * h, axis=-1, keepdims=True)
    var = meansq - mean * mean
    return (h - mean) * lax.rsqrt(var + LN_EPS) * gamma + beta


def _clip_tile_kernel(
    # batch-tiled inputs
    vf_ref, tf_ref, mos_ref,
    # image projection head params
    wpv_ref, bpv_ref, wfv_ref, bfv_ref, gv_ref, betav_ref,
    # text projection head params
    wpt_ref, bpt_ref, wft_ref, bft_ref, gt_ref, betat_ref,
    # classifier weight (1, 256)
    wc_ref,
    # per-tile outputs
    svv_ref, stt_ref, ssim_ref, dotwc_ref,
    *, batch, tile_b,
):
    i = pl.program_id(0)

    # In-kernel bf16 cast (features arrive f32 straight from HBM).
    v_emb = _projection_head(vf_ref[...].astype(jnp.bfloat16),
                             wpv_ref[...], bpv_ref[...], wfv_ref[...],
                             bfv_ref[...], gv_ref[...], betav_ref[...])   # (TB,256) f32
    t_emb = _projection_head(tf_ref[...].astype(jnp.bfloat16),
                             wpt_ref[...], bpt_ref[...], wft_ref[...],
                             bft_ref[...], gt_ref[...], betat_ref[...])   # (TB,256) f32

    # Row-validity mask for the zero-padded batch tail (pad rows are zeroed in
    # the wrapper, so they stay finite through the head; mask removes them).
    row_ids = lax.broadcasted_iota(jnp.int32, (tile_b, 1), 0) + i * tile_b
    mask = (row_ids < batch).astype(jnp.float32)                          # (TB, 1)

    prod = v_emb * t_emb                                                  # (TB, 256)
    dot = jnp.sum(prod, axis=-1, keepdims=True)                           # (TB, 1)
    nv2 = jnp.sum(v_emb * v_emb, axis=-1, keepdims=True)
    nt2 = jnp.sum(t_emb * t_emb, axis=-1, keepdims=True)

    # nn.CosineSimilarity(dim=1, eps=1e-6): x.y / max(||x||*||y||, eps)
    #   == x.y * rsqrt(max(||x||^2 * ||y||^2, eps^2))
    cos = dot * lax.rsqrt(jnp.maximum(nv2 * nt2, COS_EPS * COS_EPS))
    sim = (cos + 1.0) * 0.5                                               # (TB, 1)
    sim_d = (sim - mos_ref[...]) * mask

    # Per-tile partial sums (independent across tiles -> "parallel" grid axis).
    svv_ref[...] = jnp.sum(nv2 * mask, axis=0, keepdims=True).reshape(1, 1, 1)
    stt_ref[...] = jnp.sum(nt2 * mask, axis=0, keepdims=True).reshape(1, 1, 1)
    ssim_ref[...] = jnp.sum(sim_d * sim_d, axis=0, keepdims=True).reshape(1, 1, 1)

    # classification_model Linear(256->1) pre-activation, emitted LANE-DENSE as
    # (1, tile_b) via wc @ prod^T (transposed-RHS dot_general, flash-attn style).
    # The global-norm scale (known only after all tiles) is applied in the
    # JAX epilogue together with bias + sigmoid.
    dotwc = lax.dot_general(
        wc_ref[...], prod,
        dimension_numbers=(((1,), (1,)), ((), ())),
        preferred_element_type=jnp.float32)                               # (1, TB)
    dotwc_ref[...] = dotwc.reshape(1, 1, tile_b)


def init_params(key):
    """Deterministic parameter init matching nn.Linear / nn.LayerNorm shapes.

    Linear weights are stored transposed as (in_features, out_features) so the
    kernel does x @ W directly.  The classifier weight is stored as (1, 256)."""
    def linear(k, fan_in, fan_out):
        kw, kb = jax.random.split(k)
        bound = 1.0 / math.sqrt(fan_in)
        w = jax.random.uniform(kw, (fan_in, fan_out), jnp.float32, -bound, bound)
        b = jax.random.uniform(kb, (1, fan_out), jnp.float32, -bound, bound)
        return w, b

    k = jax.random.split(key, 5)
    wpv, bpv = linear(k[0], VIDEO_EMB, PROJ_DIM)   # image_projection.projection
    wfv, bfv = linear(k[1], PROJ_DIM, PROJ_DIM)    # image_projection.fc
    gv = jnp.ones((1, PROJ_DIM), jnp.float32)      # image_projection.layer_norm
    betav = jnp.zeros((1, PROJ_DIM), jnp.float32)

    wpt, bpt = linear(k[2], TEXT_EMB, PROJ_DIM)    # text_projection.projection
    wft, bft = linear(k[3], PROJ_DIM, PROJ_DIM)    # text_projection.fc
    gt = jnp.ones((1, PROJ_DIM), jnp.float32)      # text_projection.layer_norm
    betat = jnp.zeros((1, PROJ_DIM), jnp.float32)

    wc_t, bc = linear(k[4], PROJ_DIM, 1)           # classification_model[0]
    wc = wc_t.T                                    # (1, 256)

    return (wpv, bpv, wfv, bfv, gv, betav,
            wpt, bpt, wft, bft, gt, betat,
            wc, bc)


@jax.jit
def clip_model_loss(video_features, text_features, mos, params):
    """CLIPModel.forward downstream of the encoders -> scalar loss."""
    (wpv, bpv, wfv, bfv, gv, betav,
     wpt, bpt, wft, bft, gt, betat, wc, bc) = params

    b = video_features.shape[0]
    # Single 16-row-aligned tile for small B, else 512-row tiles (sweepable).
    tile_b = _round_up(b, 16) if b <= MAX_BATCH_TILE else MAX_BATCH_TILE
    b_pad = _round_up(b, tile_b)
    num_tiles = b_pad // tile_b

    f32 = jnp.float32
    bf16 = jnp.bfloat16

    # Features stay f32 in HBM at native widths (K=400/768): the bf16 cast
    # happens in-kernel and Mosaic pads the matmul contraction layout itself.
    # Only the batch tail is explicitly zero-padded (load-bearing: pad rows
    # must be finite so the mask can neutralize them).
    vf = jnp.pad(video_features.astype(f32), ((0, b_pad - b), (0, 0)))
    tf = jnp.pad(text_features.astype(f32), ((0, b_pad - b), (0, 0)))
    mos_col = jnp.pad(mos.astype(f32).reshape(b, 1), ((0, b_pad - b), (0, 0)))

    weights = (wpv.astype(bf16), bpv, wfv.astype(bf16), bfv, gv, betav,
               wpt.astype(bf16), bpt, wft.astype(bf16), bft, gt, betat, wc)

    data_specs = [
        pl.BlockSpec((tile_b, VIDEO_EMB), lambda i: (i, 0)),
        pl.BlockSpec((tile_b, TEXT_EMB), lambda i: (i, 0)),
        pl.BlockSpec((tile_b, 1), lambda i: (i, 0)),
    ]
    # Full-array weight blocks; constant index_map -> stay resident across tiles.
    weight_specs = [pl.BlockSpec(w.shape, lambda i: (0, 0)) for w in weights]

    kernel = functools.partial(_clip_tile_kernel, batch=b, tile_b=tile_b)

    svv, stt, ssim, dotwc = pl.pallas_call(
        kernel,
        out_shape=(
            jax.ShapeDtypeStruct((num_tiles, 1, 1), f32),       # sum(v_emb^2) per tile
            jax.ShapeDtypeStruct((num_tiles, 1, 1), f32),       # sum(t_emb^2) per tile
            jax.ShapeDtypeStruct((num_tiles, 1, 1), f32),       # sum((sim-mos)^2) per tile
            jax.ShapeDtypeStruct((num_tiles, 1, tile_b), f32),  # lane-dense classifier pre-act
        ),
        grid=(num_tiles,),
        in_specs=data_specs + weight_specs,
        out_specs=(
            pl.BlockSpec((1, 1, 1), lambda i: (i, 0, 0)),
            pl.BlockSpec((1, 1, 1), lambda i: (i, 0, 0)),
            pl.BlockSpec((1, 1, 1), lambda i: (i, 0, 0)),
            pl.BlockSpec((1, 1, tile_b), lambda i: (i, 0, 0)),
        ),
        compiler_params=pltpu.CompilerParams(
            # Tiles are independent (no accumulators) -> megacore-parallel.
            dimension_semantics=("parallel",),
            vmem_limit_bytes=32 * 1024 * 1024,
        ),
    )(vf, tf, mos_col, *weights)

    # ---- O(B) epilogue (plain JAX): global norm, sigmoid, both losses. ----
    bfl = float(b)
    # torch.norm(v_emb) * torch.norm(t_emb) == sqrt(sum v^2 * sum t^2)
    inv_mag = lax.rsqrt(jnp.sum(svv) * jnp.sum(stt))
    logits = dotwc.reshape(-1)[:b] * inv_mag + bc[0, 0]
    o = jax.nn.sigmoid(logits)                                  # (B,)
    s_o = jnp.sum(o)
    s_o2 = jnp.sum(o * o)
    mos_f = mos.astype(f32)
    sm = jnp.sum(mos_f)
    sm2 = jnp.sum(mos_f * mos_f)
    # Closed form of PyTorch's MSE((B,1), (B,)) -> (B,B) broadcast:
    #   mean_{i,j}(o_i - m_j)^2 = (B*sum(o^2) - 2*sum(o)*sum(m) + B*sum(m^2)) / B^2
    cls_loss = (bfl * s_o2 - 2.0 * s_o * sm + bfl * sm2) / (bfl * bfl)
    sim_loss = jnp.sum(ssim) / bfl
    return (sim_loss + 3.0 * cls_loss) * 0.25


def reference_loss(video_features, text_features, mos, params):
    """Pure-JAX f32 reference with the original PyTorch semantics."""
    (wpv, bpv, wfv, bfv, gv, betav,
     wpt, bpt, wft, bft, gt, betat, wc, bc) = params

    def head(x, wp, bp, wf, bf, g, beta):
        projected = x @ wp + bp
        h = 0.5 * projected * (1.0 + lax.erf(projected * INV_SQRT2))
        h = h @ wf + bf
        h = h + projected
        mean = h.mean(-1, keepdims=True)
        var = ((h - mean) ** 2).mean(-1, keepdims=True)
        return (h - mean) / jnp.sqrt(var + LN_EPS) * g + beta

    v = head(video_features, wpv, bpv, wfv, bfv, gv, betav)
    t = head(text_features, wpt, bpt, wft, bft, gt, betat)
    cosv = jnp.sum(v * t, -1) / jnp.maximum(
        jnp.linalg.norm(v, axis=-1) * jnp.linalg.norm(t, axis=-1), COS_EPS)
    sim = (cosv + 1.0) * 0.5
    mag = jnp.sqrt(jnp.sum(v * v)) * jnp.sqrt(jnp.sum(t * t))
    nd = (v * t) / mag
    o = jax.nn.sigmoid(nd @ wc.T + bc)                     # (B, 1)
    sim_loss = jnp.mean((sim - mos) ** 2)
    cls_loss = jnp.mean((o - mos[None, :]) ** 2)           # (B,1)-(B,) -> (B,B)
    return (sim_loss + 3.0 * cls_loss) / 4.0


if __name__ == "__main__":
    B = 8
    key = jax.random.PRNGKey(0)
    k_params, k_vid, k_txt, k_mos = jax.random.split(key, 4)

    params = init_params(k_params)
    # Stand-ins for the pretrained encoder outputs:
    video_features = jax.random.normal(k_vid, (B, VIDEO_EMB), jnp.float32)
    text_features = jax.random.normal(k_txt, (B, TEXT_EMB), jnp.float32)
    mos = jax.random.uniform(k_mos, (B,), jnp.float32)     # MOS targets in [0, 1)

    loss = clip_model_loss(video_features, text_features, mos, params)
    jax.block_until_ready(loss)

    ref = reference_loss(video_features, text_features, mos, params)
    assert loss.shape == () and jnp.isfinite(loss)
    # bf16 MXU operands -> small numerical drift vs. the f32 reference.
    assert jnp.allclose(loss, ref, rtol=0.1, atol=0.02), (loss, ref)
    print("KERNEL_OK")
</pallas_src>

<mosaic_0001>
module attributes {stable_mosaic.version = 11 : i64} {
  func.func @_clip_tile_kernel(%arg0: i32, %arg1: memref<16x400xf32, #tpu.memory_space<vmem>>, %arg2: memref<16x768xf32, #tpu.memory_space<vmem>>, %arg3: memref<16x1xf32, #tpu.memory_space<vmem>>, %arg4: memref<400x256xbf16, #tpu.memory_space<vmem>>, %arg5: memref<1x256xf32, #tpu.memory_space<vmem>>, %arg6: memref<256x256xbf16, #tpu.memory_space<vmem>>, %arg7: memref<1x256xf32, #tpu.memory_space<vmem>>, %arg8: memref<1x256xf32, #tpu.memory_space<vmem>>, %arg9: memref<1x256xf32, #tpu.memory_space<vmem>>, %arg10: memref<768x256xbf16, #tpu.memory_space<vmem>>, %arg11: memref<1x256xf32, #tpu.memory_space<vmem>>, %arg12: memref<256x256xbf16, #tpu.memory_space<vmem>>, %arg13: memref<1x256xf32, #tpu.memory_space<vmem>>, %arg14: memref<1x256xf32, #tpu.memory_space<vmem>>, %arg15: memref<1x256xf32, #tpu.memory_space<vmem>>, %arg16: memref<1x256xf32, #tpu.memory_space<vmem>>, %arg17: memref<1x1x1xf32, #tpu.memory_space<vmem>>, %arg18: memref<1x1x1xf32, #tpu.memory_space<vmem>>, %arg19: memref<1x1x1xf32, #tpu.memory_space<vmem>>, %arg20: memref<1x1x16xf32, #tpu.memory_space<vmem>>) attributes {dimension_semantics = [#tpu.dimension_semantics<parallel>], iteration_bounds = array<i64: 1>, scalar_prefetch = 0 : i64, scratch_operands = 0 : i64, tpu.core_type = #tpu.core_type<tc>, window_params = [{transform_indices = @transform_0, window_bounds = array<i64: 16, 400>}, {transform_indices = @transform_1, window_bounds = array<i64: 16, 768>}, {transform_indices = @transform_2, window_bounds = array<i64: 16, 1>}, {pipeline_mode = #tpu.pipeline_mode<synchronous>, transform_indices = @transform_3, window_bounds = array<i64: 400, 256>}, {pipeline_mode = #tpu.pipeline_mode<synchronous>, transform_indices = @transform_4, window_bounds = array<i64: 1, 256>}, {pipeline_mode = #tpu.pipeline_mode<synchronous>, transform_indices = @transform_5, window_bounds = array<i64: 256, 256>}, {pipeline_mode = #tpu.pipeline_mode<synchronous>, transform_indices = @transform_6, window_bounds = array<i64: 1, 256>}, {pipeline_mode = #tpu.pipeline_mode<synchronous>, transform_indices = @transform_7, window_bounds = array<i64: 1, 256>}, {pipeline_mode = #tpu.pipeline_mode<synchronous>, transform_indices = @transform_8, window_bounds = array<i64: 1, 256>}, {pipeline_mode = #tpu.pipeline_mode<synchronous>, transform_indices = @transform_9, window_bounds = array<i64: 768, 256>}, {pipeline_mode = #tpu.pipeline_mode<synchronous>, transform_indices = @transform_10, window_bounds = array<i64: 1, 256>}, {pipeline_mode = #tpu.pipeline_mode<synchronous>, transform_indices = @transform_11, window_bounds = array<i64: 256, 256>}, {pipeline_mode = #tpu.pipeline_mode<synchronous>, transform_indices = @transform_12, window_bounds = array<i64: 1, 256>}, {pipeline_mode = #tpu.pipeline_mode<synchronous>, transform_indices = @transform_13, window_bounds = array<i64: 1, 256>}, {pipeline_mode = #tpu.pipeline_mode<synchronous>, transform_indices = @transform_14, window_bounds = array<i64: 1, 256>}, {pipeline_mode = #tpu.pipeline_mode<synchronous>, transform_indices = @transform_15, window_bounds = array<i64: 1, 256>}, {transform_indices = @transform_16, window_bounds = array<i64: 1, 1, 1>}, {transform_indices = @transform_17, window_bounds = array<i64: 1, 1, 1>}, {transform_indices = @transform_18, window_bounds = array<i64: 1, 1, 1>}, {transform_indices = @transform_19, window_bounds = array<i64: 1, 1, 16>}]} {
    %c0 = arith.constant 0 : index
    %c0_0 = arith.constant 0 : index
    %0 = vector.load %arg1[%c0, %c0_0] : memref<16x400xf32, #tpu.memory_space<vmem>>, vector<16x400xf32>
    %1 = arith.truncf %0 : vector<16x400xf32> to vector<16x400xbf16>
    %c0_1 = arith.constant 0 : index
    %c0_2 = arith.constant 0 : index
    %2 = vector.load %arg4[%c0_1, %c0_2] : memref<400x256xbf16, #tpu.memory_space<vmem>>, vector<400x256xbf16>
    %c0_3 = arith.constant 0 : index
    %c0_4 = arith.constant 0 : index
    %3 = vector.load %arg5[%c0_3, %c0_4] : memref<1x256xf32, #tpu.memory_space<vmem>>, vector<1x256xf32>
    %c0_5 = arith.constant 0 : index
    %c0_6 = arith.constant 0 : index
    %4 = vector.load %arg6[%c0_5, %c0_6] : memref<256x256xbf16, #tpu.memory_space<vmem>>, vector<256x256xbf16>
    %c0_7 = arith.constant 0 : index
    %c0_8 = arith.constant 0 : index
    %5 = vector.load %arg7[%c0_7, %c0_8] : memref<1x256xf32, #tpu.memory_space<vmem>>, vector<1x256xf32>
    %c0_9 = arith.constant 0 : index
    %c0_10 = arith.constant 0 : index
    %6 = vector.load %arg8[%c0_9, %c0_10] : memref<1x256xf32, #tpu.memory_space<vmem>>, vector<1x256xf32>
    %c0_11 = arith.constant 0 : index
    %c0_12 = arith.constant 0 : index
    %7 = vector.load %arg9[%c0_11, %c0_12] : memref<1x256xf32, #tpu.memory_space<vmem>>, vector<1x256xf32>
    %cst = arith.constant dense<0.000000e+00> : vector<16x256xf32>
    %8 = tpu.matmul %1, %2, %cst {dimension_numbers = #tpu.dot_dimension_numbers<[1], [0], [0], [1], [0, 0, 1, 1], [], []>} : vector<16x400xbf16>, vector<400x256xbf16>, vector<16x256xf32> -> vector<16x256xf32>
    %9 = vector.broadcast %3 : vector<1x256xf32> to vector<16x256xf32>
    %10 = arith.addf %8, %9 : vector<16x256xf32>
    %cst_13 = arith.constant 5.000000e-01 : f32
    %11 = vector.broadcast %cst_13 : f32 to vector<16x256xf32>
    %12 = arith.mulf %11, %10 : vector<16x256xf32>
    %cst_14 = arith.constant 0.707106769 : f32
    %13 = vector.broadcast %cst_14 : f32 to vector<16x256xf32>
    %14 = arith.mulf %10, %13 : vector<16x256xf32>
    %15 = math.erf %14 : vector<16x256xf32>
    %cst_15 = arith.constant 1.000000e+00 : f32
    %16 = vector.broadcast %cst_15 : f32 to vector<16x256xf32>
    %17 = arith.addf %16, %15 : vector<16x256xf32>
    %18 = arith.mulf %12, %17 : vector<16x256xf32>
    %19 = arith.truncf %18 : vector<16x256xf32> to vector<16x256xbf16>
    %cst_16 = arith.constant dense<0.000000e+00> : vector<16x256xf32>
    %20 = tpu.matmul %19, %4, %cst_16 {dimension_numbers = #tpu.dot_dimension_numbers<[1], [0], [0], [1], [0, 0, 1, 1], [], []>} : vector<16x256xbf16>, vector<256x256xbf16>, vector<16x256xf32> -> vector<16x256xf32>
    %21 = vector.broadcast %5 : vector<1x256xf32> to vector<16x256xf32>
    %22 = arith.addf %20, %21 : vector<16x256xf32>
    %23 = arith.addf %22, %10 : vector<16x256xf32>
    %cst_17 = arith.constant dense<0.000000e+00> : vector<16xf32>
    %24 = vector.multi_reduction <add>, %23, %cst_17 [1] : vector<16x256xf32> to vector<16xf32>
    %25 = vector.shape_cast %24 : vector<16xf32> to vector<16x1xf32>
    %cst_18 = arith.constant 2.560000e+02 : f32
    %26 = vector.broadcast %cst_18 : f32 to vector<16x1xf32>
    %27 = arith.divf %25, %26 : vector<16x1xf32>
    %28 = arith.mulf %23, %23 : vector<16x256xf32>
    %cst_19 = arith.constant dense<0.000000e+00> : vector<16xf32>
    %29 = vector.multi_reduction <add>, %28, %cst_19 [1] : vector<16x256xf32> to vector<16xf32>
    %30 = vector.shape_cast %29 : vector<16xf32> to vector<16x1xf32>
    %cst_20 = arith.constant 2.560000e+02 : f32
    %31 = vector.broadcast %cst_20 : f32 to vector<16x1xf32>
    %32 = arith.divf %30, %31 : vector<16x1xf32>
    %33 = arith.mulf %27, %27 : vector<16x1xf32>
    %34 = arith.subf %32, %33 : vector<16x1xf32>
    %35 = vector.broadcast %27 : vector<16x1xf32> to vector<16x256xf32>
    %36 = arith.subf %23, %35 : vector<16x256xf32>
    %cst_21 = arith.constant 9.99999974E-6 : f32
    %37 = vector.broadcast %cst_21 : f32 to vector<16x1xf32>
    %38 = arith.addf %34, %37 : vector<16x1xf32>
    %39 = math.rsqrt %38 : vector<16x1xf32>
    %40 = vector.broadcast %39 : vector<16x1xf32> to vector<16x256xf32>
    %41 = arith.mulf %36, %40 : vector<16x256xf32>
    %42 = vector.broadcast %6 : vector<1x256xf32> to vector<16x256xf32>
    %43 = arith.mulf %41, %42 : vector<16x256xf32>
    %44 = vector.broadcast %7 : vector<1x256xf32> to vector<16x256xf32>
    %45 = arith.addf %43, %44 : vector<16x256xf32>
    %c0_22 = arith.constant 0 : index
    %c0_23 = arith.constant 0 : index
    %46 = vector.load %arg2[%c0_22, %c0_23] : memref<16x768xf32, #tpu.memory_space<vmem>>, vector<16x768xf32>
    %47 = arith.truncf %46 : vector<16x768xf32> to vector<16x768xbf16>
    %c0_24 = arith.constant 0 : index
    %c0_25 = arith.constant 0 : index
    %48 = vector.load %arg10[%c0_24, %c0_25] : memref<768x256xbf16, #tpu.memory_space<vmem>>, vector<768x256xbf16>
    %c0_26 = arith.constant 0 : index
    %c0_27 = arith.constant 0 : index
    %49 = vector.load %arg11[%c0_26, %c0_27] : memref<1x256xf32, #tpu.memory_space<vmem>>, vector<1x256xf32>
    %c0_28 = arith.constant 0 : index
    %c0_29 = arith.constant 0 : index
    %50 = vector.load %arg12[%c0_28, %c0_29] : memref<256x256xbf16, #tpu.memory_space<vmem>>, vector<256x256xbf16>
    %c0_30 = arith.constant 0 : index
    %c0_31 = arith.constant 0 : index
    %51 = vector.load %arg13[%c0_30, %c0_31] : memref<1x256xf32, #tpu.memory_space<vmem>>, vector<1x256xf32>
    %c0_32 = arith.constant 0 : index
    %c0_33 = arith.constant 0 : index
    %52 = vector.load %arg14[%c0_32, %c0_33] : memref<1x256xf32, #tpu.memory_space<vmem>>, vector<1x256xf32>
    %c0_34 = arith.constant 0 : index
    %c0_35 = arith.constant 0 : index
    %53 = vector.load %arg15[%c0_34, %c0_35] : memref<1x256xf32, #tpu.memory_space<vmem>>, vector<1x256xf32>
    %cst_36 = arith.constant dense<0.000000e+00> : vector<16x256xf32>
    %54 = tpu.matmul %47, %48, %cst_36 {dimension_numbers = #tpu.dot_dimension_numbers<[1], [0], [0], [1], [0, 0, 1, 1], [], []>} : vector<16x768xbf16>, vector<768x256xbf16>, vector<16x256xf32> -> vector<16x256xf32>
    %55 = vector.broadcast %49 : vector<1x256xf32> to vector<16x256xf32>
    %56 = arith.addf %54, %55 : vector<16x256xf32>
    %cst_37 = arith.constant 5.000000e-01 : f32
    %57 = vector.broadcast %cst_37 : f32 to vector<16x256xf32>
    %58 = arith.mulf %57, %56 : vector<16x256xf32>
    %cst_38 = arith.constant 0.707106769 : f32
    %59 = vector.broadcast %cst_38 : f32 to vector<16x256xf32>
    %60 = arith.mulf %56, %59 : vector<16x256xf32>
    %61 = math.erf %60 : vector<16x256xf32>
    %cst_39 = arith.constant 1.000000e+00 : f32
    %62 = vector.broadcast %cst_39 : f32 to vector<16x256xf32>
    %63 = arith.addf %62, %61 : vector<16x256xf32>
    %64 = arith.mulf %58, %63 : vector<16x256xf32>
    %65 = arith.truncf %64 : vector<16x256xf32> to vector<16x256xbf16>
    %cst_40 = arith.constant dense<0.000000e+00> : vector<16x256xf32>
    %66 = tpu.matmul %65, %50, %cst_40 {dimension_numbers = #tpu.dot_dimension_numbers<[1], [0], [0], [1], [0, 0, 1, 1], [], []>} : vector<16x256xbf16>, vector<256x256xbf16>, vector<16x256xf32> -> vector<16x256xf32>
    %67 = vector.broadcast %51 : vector<1x256xf32> to vector<16x256xf32>
    %68 = arith.addf %66, %67 : vector<16x256xf32>
    %69 = arith.addf %68, %56 : vector<16x256xf32>
    %cst_41 = arith.constant dense<0.000000e+00> : vector<16xf32>
    %70 = vector.multi_reduction <add>, %69, %cst_41 [1] : vector<16x256xf32> to vector<16xf32>
    %71 = vector.shape_cast %70 : vector<16xf32> to vector<16x1xf32>
    %cst_42 = arith.constant 2.560000e+02 : f32
    %72 = vector.broadcast %cst_42 : f32 to vector<16x1xf32>
    %73 = arith.divf %71, %72 : vector<16x1xf32>
    %74 = arith.mulf %69, %69 : vector<16x256xf32>
    %cst_43 = arith.constant dense<0.000000e+00> : vector<16xf32>
    %75 = vector.multi_reduction <add>, %74, %cst_43 [1] : vector<16x256xf32> to vector<16xf32>
    %76 = vector.shape_cast %75 : vector<16xf32> to vector<16x1xf32>
    %cst_44 = arith.constant 2.560000e+02 : f32
    %77 = vector.broadcast %cst_44 : f32 to vector<16x1xf32>
    %78 = arith.divf %76, %77 : vector<16x1xf32>
    %79 = arith.mulf %73, %73 : vector<16x1xf32>
    %80 = arith.subf %78, %79 : vector<16x1xf32>
    %81 = vector.broadcast %73 : vector<16x1xf32> to vector<16x256xf32>
    %82 = arith.subf %69, %81 : vector<16x256xf32>
    %cst_45 = arith.constant 9.99999974E-6 : f32
    %83 = vector.broadcast %cst_45 : f32 to vector<16x1xf32>
    %84 = arith.addf %80, %83 : vector<16x1xf32>
    %85 = math.rsqrt %84 : vector<16x1xf32>
    %86 = vector.broadcast %85 : vector<16x1xf32> to vector<16x256xf32>
    %87 = arith.mulf %82, %86 : vector<16x256xf32>
    %88 = vector.broadcast %52 : vector<1x256xf32> to vector<16x256xf32>
    %89 = arith.mulf %87, %88 : vector<16x256xf32>
    %90 = vector.broadcast %53 : vector<1x256xf32> to vector<16x256xf32>
    %91 = arith.addf %89, %90 : vector<16x256xf32>
    %92 = tpu.iota {dimensions = array<i32: 0>} : vector<16x1xi32>
    %c16_i32 = arith.constant 16 : i32
    %93 = arith.muli %arg0, %c16_i32 : i32
    %94 = vector.broadcast %93 : i32 to vector<16x1xi32>
    %95 = arith.addi %92, %94 : vector<16x1xi32>
    %c8_i32 = arith.constant 8 : i32
    %96 = vector.broadcast %c8_i32 : i32 to vector<16x1xi32>
    %97 = arith.cmpi slt, %95, %96 : vector<16x1xi32>
    %98 = arith.extui %97 : vector<16x1xi1> to vector<16x1xi32>
    %99 = arith.sitofp %98 : vector<16x1xi32> to vector<16x1xf32>
    %100 = arith.mulf %45, %91 : vector<16x256xf32>
    %cst_46 = arith.constant dense<0.000000e+00> : vector<16xf32>
    %101 = vector.multi_reduction <add>, %100, %cst_46 [1] : vector<16x256xf32> to vector<16xf32>
    %102 = vector.shape_cast %101 : vector<16xf32> to vector<16x1xf32>
    %103 = arith.mulf %45, %45 : vector<16x256xf32>
    %cst_47 = arith.constant dense<0.000000e+00> : vector<16xf32>
    %104 = vector.multi_reduction <add>, %103, %cst_47 [1] : vector<16x256xf32> to vector<16xf32>
    %105 = vector.shape_cast %104 : vector<16xf32> to vector<16x1xf32>
    %106 = arith.mulf %91, %91 : vector<16x256xf32>
    %cst_48 = arith.constant dense<0.000000e+00> : vector<16xf32>
    %107 = vector.multi_reduction <add>, %106, %cst_48 [1] : vector<16x256xf32> to vector<16xf32>
    %108 = vector.shape_cast %107 : vector<16xf32> to vector<16x1xf32>
    %109 = arith.mulf %105, %108 : vector<16x1xf32>
    %cst_49 = arith.constant 9.99999996E-13 : f32
    %110 = vector.broadcast %cst_49 : f32 to vector<16x1xf32>
    %111 = arith.maximumf %109, %110 : vector<16x1xf32>
    %112 = math.rsqrt %111 : vector<16x1xf32>
    %113 = arith.mulf %102, %112 : vector<16x1xf32>
    %cst_50 = arith.constant 1.000000e+00 : f32
    %114 = vector.broadcast %cst_50 : f32 to vector<16x1xf32>
    %115 = arith.addf %113, %114 : vector<16x1xf32>
    %cst_51 = arith.constant 5.000000e-01 : f32
    %116 = vector.broadcast %cst_51 : f32 to vector<16x1xf32>
    %117 = arith.mulf %115, %116 : vector<16x1xf32>
    %c0_52 = arith.constant 0 : index
    %c0_53 = arith.constant 0 : index
    %118 = vector.load %arg3[%c0_52, %c0_53] : memref<16x1xf32, #tpu.memory_space<vmem>>, vector<16x1xf32>
    %119 = arith.subf %117, %118 : vector<16x1xf32>
    %120 = arith.mulf %119, %99 : vector<16x1xf32>
    %121 = arith.mulf %105, %99 : vector<16x1xf32>
    %cst_54 = arith.constant dense<0.000000e+00> : vector<1xf32>
    %122 = vector.multi_reduction <add>, %121, %cst_54 [0] : vector<16x1xf32> to vector<1xf32>
    %123 = vector.shape_cast %122 : vector<1xf32> to vector<1x1xf32>
    %124 = vector.shape_cast %123 : vector<1x1xf32> to vector<1x1x1xf32>
    %c0_55 = arith.constant 0 : index
    %c0_56 = arith.constant 0 : index
    %c0_57 = arith.constant 0 : index
    %125 = vector.load %arg17[%c0_55, %c0_56, %c0_57] : memref<1x1x1xf32, #tpu.memory_space<vmem>>, vector<1x1x1xf32>
    tpu.vector_store %arg17[%c0_55, %c0_56, %c0_57], %124 {strides = array<i32>} : memref<1x1x1xf32, #tpu.memory_space<vmem>>, vector<1x1x1xf32>,
    %126 = arith.mulf %108, %99 : vector<16x1xf32>
    %cst_58 = arith.constant dense<0.000000e+00> : vector<1xf32>
    %127 = vector.multi_reduction <add>, %126, %cst_58 [0] : vector<16x1xf32> to vector<1xf32>
    %128 = vector.shape_cast %127 : vector<1xf32> to vector<1x1xf32>
    %129 = vector.shape_cast %128 : vector<1x1xf32> to vector<1x1x1xf32>
    %c0_59 = arith.constant 0 : index
    %c0_60 = arith.constant 0 : index
    %c0_61 = arith.constant 0 : index
    %130 = vector.load %arg18[%c0_59, %c0_60, %c0_61] : memref<1x1x1xf32, #tpu.memory_space<vmem>>, vector<1x1x1xf32>
    tpu.vector_store %arg18[%c0_59, %c0_60, %c0_61], %129 {strides = array<i32>} : memref<1x1x1xf32, #tpu.memory_space<vmem>>, vector<1x1x1xf32>,
    %131 = arith.mulf %120, %120 : vector<16x1xf32>
    %cst_62 = arith.constant dense<0.000000e+00> : vector<1xf32>
    %132 = vector.multi_reduction <add>, %131, %cst_62 [0] : vector<16x1xf32> to vector<1xf32>
    %133 = vector.shape_cast %132 : vector<1xf32> to vector<1x1xf32>
    %134 = vector.shape_cast %133 : vector<1x1xf32> to vector<1x1x1xf32>
    %c0_63 = arith.constant 0 : index
    %c0_64 = arith.constant 0 : index
    %c0_65 = arith.constant 0 : index
    %135 = vector.load %arg19[%c0_63, %c0_64, %c0_65] : memref<1x1x1xf32, #tpu.memory_space<vmem>>, vector<1x1x1xf32>
    tpu.vector_store %arg19[%c0_63, %c0_64, %c0_65], %134 {strides = array<i32>} : memref<1x1x1xf32, #tpu.memory_space<vmem>>, vector<1x1x1xf32>,
    %c0_66 = arith.constant 0 : index
    %c0_67 = arith.constant 0 : index
    %136 = vector.load %arg16[%c0_66, %c0_67] : memref<1x256xf32, #tpu.memory_space<vmem>>, vector<1x256xf32>
    %cst_68 = arith.constant dense<0.000000e+00> : vector<1x16xf32>
    %137 = tpu.matmul %136, %100, %cst_68 {dimension_numbers = #tpu.dot_dimension_numbers<[1], [1], [0], [0], [0, 0, 1, 0], [], []>} : vector<1x256xf32>, vector<16x256xf32>, vector<1x16xf32> -> vector<1x16xf32>
    %138 = vector.shape_cast %137 : vector<1x16xf32> to vector<1x1x16xf32>
    %c0_69 = arith.constant 0 : index
    %c0_70 = arith.constant 0 : index
    %c0_71 = arith.constant 0 : index
    %139 = vector.load %arg20[%c0_69, %c0_70, %c0_71] : memref<1x1x16xf32, #tpu.memory_space<vmem>>, vector<1x1x16xf32>
    tpu.vector_store %arg20[%c0_69, %c0_70, %c0_71], %138 {strides = array<i32>} : memref<1x1x16xf32, #tpu.memory_space<vmem>>, vector<1x1x16xf32>,
    return
  }
  func.func @transform_0(%arg0: i32) -> (i32, i32) {
    %c0_i32 = arith.constant 0 : i32
    %c0_i32_0 = arith.constant 0 : i32
    return %arg0, %c0_i32 : i32, i32
  }
  func.func @transform_1(%arg0: i32) -> (i32, i32) {
    %c0_i32 = arith.constant 0 : i32
    %c0_i32_0 = arith.constant 0 : i32
    return %arg0, %c0_i32 : i32, i32
  }
  func.func @transform_2(%arg0: i32) -> (i32, i32) {
    %c0_i32 = arith.constant 0 : i32
    %c0_i32_0 = arith.constant 0 : i32
    return %arg0, %c0_i32 : i32, i32
  }
  func.func @transform_3(%arg0: i32) -> (i32, i32) {
    %c0_i32 = arith.constant 0 : i32
    %c0_i32_0 = arith.constant 0 : i32
    %c0_i32_1 = arith.constant 0 : i32
    return %c0_i32, %c0_i32_0 : i32, i32
  }
  func.func @transform_4(%arg0: i32) -> (i32, i32) {
    %c0_i32 = arith.constant 0 : i32
    %c0_i32_0 = arith.constant 0 : i32
    %c0_i32_1 = arith.constant 0 : i32
    return %c0_i32, %c0_i32_0 : i32, i32
  }
  func.func @transform_5(%arg0: i32) -> (i32, i32) {
    %c0_i32 = arith.constant 0 : i32
    %c0_i32_0 = arith.constant 0 : i32
    %c0_i32_1 = arith.constant 0 : i32
    return %c0_i32, %c0_i32_0 : i32, i32
  }
  func.func @transform_6(%arg0: i32) -> (i32, i32) {
    %c0_i32 = arith.constant 0 : i32
    %c0_i32_0 = arith.constant 0 : i32
    %c0_i32_1 = arith.constant 0 : i32
    return %c0_i32, %c0_i32_0 : i32, i32
  }
  func.func @transform_7(%arg0: i32) -> (i32, i32) {
    %c0_i32 = arith.constant 0 : i32
    %c0_i32_0 = arith.constant 0 : i32
    %c0_i32_1 = arith.constant 0 : i32
    return %c0_i32, %c0_i32_0 : i32, i32
  }
  func.func @transform_8(%arg0: i32) -> (i32, i32) {
    %c0_i32 = arith.constant 0 : i32
    %c0_i32_0 = arith.constant 0 : i32
    %c0_i32_1 = arith.constant 0 : i32
    return %c0_i32, %c0_i32_0 : i32, i32
  }
  func.func @transform_9(%arg0: i32) -> (i32, i32) {
    %c0_i32 = arith.constant 0 : i32
    %c0_i32_0 = arith.constant 0 : i32
    %c0_i32_1 = arith.constant 0 : i32
    return %c0_i32, %c0_i32_0 : i32, i32
  }
  func.func @transform_10(%arg0: i32) -> (i32, i32) {
    %c0_i32 = arith.constant 0 : i32
    %c0_i32_0 = arith.constant 0 : i32
    %c0_i32_1 = arith.constant 0 : i32
    return %c0_i32, %c0_i32_0 : i32, i32
  }
  func.func @transform_11(%arg0: i32) -> (i32, i32) {
    %c0_i32 = arith.constant 0 : i32
    %c0_i32_0 = arith.constant 0 : i32
    %c0_i32_1 = arith.constant 0 : i32
    return %c0_i32, %c0_i32_0 : i32, i32
  }
  func.func @transform_12(%arg0: i32) -> (i32, i32) {
    %c0_i32 = arith.constant 0 : i32
    %c0_i32_0 = arith.constant 0 : i32
    %c0_i32_1 = arith.constant 0 : i32
    return %c0_i32, %c0_i32_0 : i32, i32
  }
  func.func @transform_13(%arg0: i32) -> (i32, i32) {
    %c0_i32 = arith.constant 0 : i32
    %c0_i32_0 = arith.constant 0 : i32
    %c0_i32_1 = arith.constant 0 : i32
    return %c0_i32, %c0_i32_0 : i32, i32
  }
  func.func @transform_14(%arg0: i32) -> (i32, i32) {
    %c0_i32 = arith.constant 0 : i32
    %c0_i32_0 = arith.constant 0 : i32
    %c0_i32_1 = arith.constant 0 : i32
    return %c0_i32, %c0_i32_0 : i32, i32
  }
  func.func @transform_15(%arg0: i32) -> (i32, i32) {
    %c0_i32 = arith.constant 0 : i32
    %c0_i32_0 = arith.constant 0 : i32
    %c0_i32_1 = arith.constant 0 : i32
    return %c0_i32, %c0_i32_0 : i32, i32
  }
  func.func @transform_16(%arg0: i32) -> (i32, i32, i32) {
    %c0_i32 = arith.constant 0 : i32
    %c0_i32_0 = arith.constant 0 : i32
    %c0_i32_1 = arith.constant 0 : i32
    return %arg0, %c0_i32, %c0_i32_0 : i32, i32, i32
  }
  func.func @transform_17(%arg0: i32) -> (i32, i32, i32) {
    %c0_i32 = arith.constant 0 : i32
    %c0_i32_0 = arith.constant 0 : i32
    %c0_i32_1 = arith.constant 0 : i32
    return %arg0, %c0_i32, %c0_i32_0 : i32, i32, i32
  }
  func.func @transform_18(%arg0: i32) -> (i32, i32, i32) {
    %c0_i32 = arith.constant 0 : i32
    %c0_i32_0 = arith.constant 0 : i32
    %c0_i32_1 = arith.constant 0 : i32
    return %arg0, %c0_i32, %c0_i32_0 : i32, i32, i32
  }
  func.func @transform_19(%arg0: i32) -> (i32, i32, i32) {
    %c0_i32 = arith.constant 0 : i32
    %c0_i32_0 = arith.constant 0 : i32
    %c0_i32_1 = arith.constant 0 : i32
    return %arg0, %c0_i32, %c0_i32_0 : i32, i32, i32
  }
}

</mosaic_0001>

<bundles_post_ra>
// kernel: clip_model_loss.1
= control target key start
LH: loop header
LB: loop body
LE: loop exit
PB: predicated region body
PF: predicated region fallthrough
CT: control target
= control target key end

     0   :  { %s3767_s0 = inlined_call_operand.vmem [shape: f32[16,400], index: 0, kind: input, shape index: {}]   ;;  %s3768_s1 = inlined_call_operand.vmem [shape: f32[16,768], index: 1, kind: input, shape index: {}]   ;;  %s3769_s2 = inlined_call_operand.vmem [shape: f32[16,1], index: 2, kind: input, shape index: {}]   ;;  %s3770_s3 = inlined_call_operand.vmem [shape: bf16[400,256], index: 3, kind: input, shape index: {}]   ;;  %s3771_s4 = inlined_call_operand.vmem [shape: f32[1,256], index: 4, kind: input, shape index: {}]   ;;  %s3772_s5 = inlined_call_operand.vmem [shape: bf16[256,256], index: 5, kind: input, shape index: {}]   ;;  %s3773_s6 = inlined_call_operand.vmem [shape: f32[1,256], index: 6, kind: input, shape index: {}]   ;;  %s3774_s7 = inlined_call_operand.vmem [shape: f32[1,256], index: 7, kind: input, shape index: {}]   ;;  %s3775_s8 = inlined_call_operand.vmem [shape: f32[1,256], index: 8, kind: input, shape index: {}]   ;;  %s3776_s9 = inlined_call_operand.vmem [shape: bf16[768,256], index: 9, kind: input, shape index: {}]   ;;  %s3777_s10 = inlined_call_operand.vmem [shape: f32[1,256], index: 10, kind: input, shape index: {}]   ;;  %s3778_s11 = inlined_call_operand.vmem [shape: bf16[256,256], index: 11, kind: input, shape index: {}]   ;;  %s3779_s12 = inlined_call_operand.vmem [shape: f32[1,256], index: 12, kind: input, shape index: {}]   ;;  %s3780_s13 = inlined_call_operand.vmem [shape: f32[1,256], index: 13, kind: input, shape index: {}]   ;;  %s3781_s14 = inlined_call_operand.vmem [shape: f32[1,256], index: 14, kind: input, shape index: {}]   ;;  %s3782_s15 = inlined_call_operand.vmem [shape: f32[1,256], index: 15, kind: input, shape index: {}]   ;;  %s3783_s16 = inlined_call_operand.hbm [shape: f32[1,1,1], index: 16, kind: output, shape index: {0}]   ;;  %s3784_s17 = inlined_call_operand.hbm [shape: f32[1,1,1], index: 17, kind: output, shape index: {1}]   ;;  %s3785_s18 = inlined_call_operand.hbm [shape: f32[1,1,1], index: 18, kind: output, shape index: {2}]   ;;  %s3786_s19 = inlined_call_operand.vmem [shape: f32[1,1,16], index: 19, kind: output, shape index: {3}]  }
   0x1   :  { %3791 = sst [smem:[#allocation9_spill]] %s3767_s0 }
   0x2   :  { %3792 = sst [smem:[#allocation10_spill]] %s3768_s1 }
   0x3   :  { %3793 = sst [smem:[#allocation11_spill]] %s3769_s2 }
   0x4   :  { %3794 = sst [smem:[#allocation12_spill]] %s3770_s3 }
   0x5   :  { %25 = vsyncpa [#allocation3], 0  ;;  %s3795_s20 = sld [smem:[#allocation12_spill]]  ;;  %s3796_s21 = sld [smem:[#allocation9_spill]]  ;;  %vm419_vm0 = vcmask 130048  }
   0x6   :  { %v2412_v42 = vld [vmem:[%s3776_s9 + $0x4] ss:$8 sps:$4 sm:$0xff]   ;;  %v2410_v44 = vld [vmem:[%s3776_s9] ss:$8 sps:$4 sm:$0xff]   ;;  %v2418_v47 = vld [vmem:[%s3776_s9 + $0x14] ss:$8 sps:$4 sm:$0xff]  }
   0x7   :  { %v2416_v48 = vld [vmem:[%s3776_s9 + $0x10] ss:$8 sps:$4 sm:$0xff]   ;;  %v2424_v51 = vld [vmem:[%s3776_s9 + $0x24] ss:$8 sps:$4 sm:$0xff]   ;;  %v2422_v52 = vld [vmem:[%s3776_s9 + $0x20] ss:$8 sps:$4 sm:$0xff]  }
   0x8   :  { %v2430_v57 = vld [vmem:[%s3776_s9 + $0x34] ss:$8 sps:$4 sm:$0xff]   ;;  %v2428_v59 = vld [vmem:[%s3776_s9 + $0x30] ss:$8 sps:$4 sm:$0xff]   ;;  %v2436_v62 = vld [vmem:[%s3776_s9 + $0x44] ss:$8 sps:$4 sm:$0xff]  }
   0x9   :  { %v2434_v63 = vld [vmem:[%s3776_s9 + $0x40] ss:$8 sps:$4 sm:$0xff]   ;;  %s3797_s2 = sld [smem:[#allocation10_spill]] }
   0xb   :  { %v2354_v0 = vld [vmem:[%s3795_s20 + $0x4] ss:$8 sps:$4 sm:$0xff]   ;;  %v2358_v2 = vld [vmem:[%s3795_s20] ss:$8 sps:$4 sm:$0xff]   ;;  %v2360_v4 = vld [vmem:[%s3795_s20 + $0x14] ss:$8 sps:$4 sm:$0xff]  }
   0xc   :  { %v2356_v1 = vld [vmem:[%s3795_s20 + $0x104] ss:$8 sps:$4 sm:$0xff]   ;;  %423 = vmatprep.subr.bf16.mxu0 %v2354_v0  ;;  %v2359_v3 = vld [vmem:[%s3795_s20 + $0x100] ss:$8 sps:$4 sm:$0xff]   ;;  %v2362_v5 = vld [vmem:[%s3795_s20 + $0x114] ss:$8 sps:$4 sm:$0xff]  }
   0xd   :  { %466 = vmatprep.subr.bf16.mxu1 %v2356_v1  ;;  %424 = vmatpush1.bf16.msra.mxu0 %v2358_v2  ;;  %v2364_v6 = vld [vmem:[%s3795_s20 + $0x10] ss:$8 sps:$4 sm:$0xff]   ;;  %v2366_v8 = vld [vmem:[%s3795_s20 + $0x24] ss:$8 sps:$4 sm:$0xff]   ;;  %v2370_v10 = vld [vmem:[%s3795_s20 + $0x20] ss:$8 sps:$4 sm:$0xff]  }
   0xe   :  { %467 = vmatpush1.bf16.msra.mxu1 %v2359_v3  ;;  %425 = vmatprep.subr.bf16.mxu0 %v2360_v4  ;;  %v2365_v7 = vld [vmem:[%s3795_s20 + $0x110] ss:$8 sps:$4 sm:$0xff]   ;;  %v2368_v9 = vld [vmem:[%s3795_s20 + $0x124] ss:$8 sps:$4 sm:$0xff]   ;;  %v2371_v11 = vld [vmem:[%s3795_s20 + $0x120] ss:$8 sps:$4 sm:$0xff]  }
   0xf   :  { %468 = vmatprep.subr.bf16.mxu1 %v2362_v5  ;;  %v2372_v12 = vld [vmem:[%s3795_s20 + $0x34] ss:$8 sps:$4 sm:$0xff]   ;;  %v2376_v14 = vld [vmem:[%s3795_s20 + $0x30] ss:$8 sps:$4 sm:$0xff]   ;;  %v2378_v16 = vld [vmem:[%s3795_s20 + $0x44] ss:$8 sps:$4 sm:$0xff]  }
  0x10   :  { %v2374_v13 = vld [vmem:[%s3795_s20 + $0x134] ss:$8 sps:$4 sm:$0xff]   ;;  %v2377_v15 = vld [vmem:[%s3795_s20 + $0x130] ss:$8 sps:$4 sm:$0xff]   ;;  %v2380_v17 = vld [vmem:[%s3795_s20 + $0x144] ss:$8 sps:$4 sm:$0xff]  }
  0x11   :  { %426 = vmatpush1.bf16.msra.mxu0 %v2364_v6  ;;  %v2382_v18 = vld [vmem:[%s3795_s20 + $0x40] ss:$8 sps:$4 sm:$0xff]   ;;  %v2384_v20 = vld [vmem:[%s3795_s20 + $0x54] ss:$8 sps:$4 sm:$0xff]   ;;  %v2388_v22 = vld [vmem:[%s3795_s20 + $0x50] ss:$8 sps:$4 sm:$0xff]  }
  0x12   :  { %469 = vmatpush1.bf16.msra.mxu1 %v2365_v7  ;;  %427 = vmatprep.subr.bf16.mxu0 %v2366_v8  ;;  %v2383_v19 = vld [vmem:[%s3795_s20 + $0x140] ss:$8 sps:$4 sm:$0xff]   ;;  %v2386_v21 = vld [vmem:[%s3795_s20 + $0x154] ss:$8 sps:$4 sm:$0xff]   ;;  %v2389_v23 = vld [vmem:[%s3795_s20 + $0x150] ss:$8 sps:$4 sm:$0xff]  }
  0x13   :  { %470 = vmatprep.subr.bf16.mxu1 %v2368_v9  ;;  %v2390_v24 = vld [vmem:[%s3795_s20 + $0x64] ss:$8 sps:$4 sm:$0xff]   ;;  %v2394_v26 = vld [vmem:[%s3795_s20 + $0x60] ss:$8 sps:$4 sm:$0xff]   ;;  %v63_v28 = vld [vmem:[%s3796_s21 + $0x18] sm:$0xff] }
  0x14   :  { %v2392_v25 = vld [vmem:[%s3795_s20 + $0x164] ss:$8 sps:$4 sm:$0xff]   ;;  %v2395_v27 = vld [vmem:[%s3795_s20 + $0x160] ss:$8 sps:$4 sm:$0xff]   ;;  %v67_v29 = vld [vmem:[%s3796_s21 + $0x38] sm:$0xff] }
  0x15   :  { %428 = vmatpush1.bf16.msra.mxu0 %v2370_v10  ;;  %v2396_v30 = vld [vmem:[%s3795_s20 + $0x74] ss:$8 sps:$4 sm:$0xff]   ;;  %v71_v32 = vpack.c.bf16 %v67_v29, %v63_v28  ;;  %v2400_v33 = vld [vmem:[%s3795_s20 + $0x70] ss:$8 sps:$4 sm:$0xff]   ;;  %v2402_v35 = vld [vmem:[%s3795_s20 + $0x84] ss:$8 sps:$4 sm:$0xff]  }
  0x16   :  { %471 = vmatpush1.bf16.msra.mxu1 %v2371_v11  ;;  %429 = vmatprep.subr.bf16.mxu0 %v2372_v12  ;;  %v2398_v31 = vld [vmem:[%s3795_s20 + $0x174] ss:$8 sps:$4 sm:$0xff]   ;;  %v2401_v34 = vld [vmem:[%s3795_s20 + $0x170] ss:$8 sps:$4 sm:$0xff]   ;;  %v2404_v36 = vld [vmem:[%s3795_s20 + $0x184] ss:$8 sps:$4 sm:$0xff]  }
  0x17   :  { %472 = vmatprep.subr.bf16.mxu1 %v2374_v13  ;;  %2166 = vmatprep.mubr.msk.bf16.mxu1 %vm419_vm0, %v71_v32  ;;  %v2406_v37 = vld [vmem:[%s3795_s20 + $0x80] ss:$8 sps:$4 sm:$0xff]   ;;  %v2408_v39 = vld [vmem:[%s3795_s20 + $0x94] ss:$8 sps:$4 sm:$0xff]   ;;  %v2413_v45 = vld [vmem:[%s3795_s20 + $0x90] ss:$8 sps:$4 sm:$0xff]  }
  0x18   :  { %v2407_v38 = vld [vmem:[%s3795_s20 + $0x180] ss:$8 sps:$4 sm:$0xff]   ;;  %v62_v40 = vld [vmem:[%s3796_s21 + $0x10] sm:$0xff]  ;;  %v2414_v46 = vld [vmem:[%s3795_s20 + $0xa4] ss:$8 sps:$4 sm:$0xff]  }
  0x19   :  { %430 = vmatpush1.bf16.msra.mxu0 %v2376_v14  ;;  %v66_v41 = vld [vmem:[%s3796_s21 + $0x30] sm:$0xff]  ;;  %v2419_v49 = vld [vmem:[%s3795_s20 + $0xa0] ss:$8 sps:$4 sm:$0xff]   ;;  %v2426_v54 = vld [vmem:[%s3795_s20 + $0xc4] ss:$8 sps:$4 sm:$0xff]  }
  0x1a   :  { %473 = vmatpush1.bf16.msra.mxu1 %v2377_v15  ;;  %431 = vmatprep.subr.bf16.mxu0 %v2378_v16  ;;  %v70_v43 = vpack.c.bf16 %v66_v41, %v62_v40  ;;  %v2420_v50 = vld [vmem:[%s3795_s20 + $0xb4] ss:$8 sps:$4 sm:$0xff]   ;;  %v2425_v53 = vld [vmem:[%s3795_s20 + $0xb0] ss:$8 sps:$4 sm:$0xff]   ;;  %v61_v55 = vld [vmem:[%s3796_s21 + $0x8] sm:$0xff] }
  0x1b   :  { %474 = vmatprep.subr.bf16.mxu1 %v2380_v17  ;;  %v65_v56 = vld [vmem:[%s3796_s21 + $0x28] sm:$0xff]  ;;  %v2432_v61 = vld [vmem:[%s3795_s20 + $0xd4] ss:$8 sps:$4 sm:$0xff]   ;;  %v2437_v0 = vld [vmem:[%s3795_s20 + $0xd0] ss:$8 sps:$4 sm:$0xff]  }
  0x1c   :  { %v69_v58 = vpack.c.bf16 %v65_v56, %v61_v55  ;;  %v2431_v60 = vld [vmem:[%s3795_s20 + $0xc0] ss:$8 sps:$4 sm:$0xff]   ;;  %v2438_v1 = vld [vmem:[%s3795_s20 + $0xe4] ss:$8 sps:$4 sm:$0xff]   ;;  %v2442_v2 = vld [vmem:[%s3776_s9 + $0x54] ss:$8 sps:$4 sm:$0xff]  }
  0x1d   :  { %432 = vmatpush1.bf16.msra.mxu0 %v2382_v18  ;;  %v2440_v3 = vld [vmem:[%s3776_s9 + $0x50] ss:$8 sps:$4 sm:$0xff]   ;;  %v2443_v4 = vld [vmem:[%s3795_s20 + $0xe0] ss:$8 sps:$4 sm:$0xff]   ;;  %v2444_v5 = vld [vmem:[%s3795_s20 + $0xf4] ss:$8 sps:$4 sm:$0xff]  }
  0x1e   :  { %475 = vmatpush1.bf16.msra.mxu1 %v2383_v19  ;;  %433 = vmatprep.subr.bf16.mxu0 %v2384_v20  ;;  %v2448_v6 = vld [vmem:[%s3776_s9 + $0x64] ss:$8 sps:$4 sm:$0xff]   ;;  %v823_v8 = vld [vmem:[%s3797_s2 + $0x38] sm:$0xff]  ;;  %v2446_v10 = vld [vmem:[%s3776_s9 + $0x60] ss:$8 sps:$4 sm:$0xff]  }
  0x1f   :  { %476 = vmatprep.subr.bf16.mxu1 %v2386_v21  ;;  %455 = vmatprep.mubr.bf16.mxu0 %v69_v58  ;;  %v817_v7 = vld [vmem:[%s3797_s2 + $0x8] sm:$0xff]  ;;  %v2449_v11 = vld [vmem:[%s3795_s20 + $0xf0] ss:$8 sps:$4 sm:$0xff]   ;;  %v60_v12 = vld [vmem:[%s3796_s21] sm:$0xff] }
  0x20   :  { %v829_v9 = vpack.c.bf16 %v823_v8, %v817_v7  ;;  %v64_v13 = vld [vmem:[%s3796_s21 + $0x20] sm:$0xff]  ;;  %v2452_v14 = vld [vmem:[%s3776_s9 + $0x74] ss:$8 sps:$4 sm:$0xff]   ;;  %v2450_v16 = vld [vmem:[%s3776_s9 + $0x70] ss:$8 sps:$4 sm:$0xff]  }
  0x21   :  { %434 = vmatpush1.bf16.msra.mxu0 %v2388_v22  ;;  %v68_v15 = vpack.c.bf16 %v64_v13, %v60_v12  ;;  %v2455_v17 = vld [vmem:[%s3776_s9 + $0x84] ss:$8 sps:$4 sm:$0xff]   ;;  %v2453_v18 = vld [vmem:[%s3776_s9 + $0x80] ss:$8 sps:$4 sm:$0xff]   ;;  %v2458_v19 = vld [vmem:[%s3776_s9 + $0x94] ss:$8 sps:$4 sm:$0xff]  }
  0x22   :  { %477 = vmatpush1.bf16.msra.mxu1 %v2389_v23  ;;  %435 = vmatprep.subr.bf16.mxu0 %v2390_v24  ;;  %v2456_v20 = vld [vmem:[%s3776_s9 + $0x90] ss:$8 sps:$4 sm:$0xff]   ;;  %v2461_v21 = vld [vmem:[%s3776_s9 + $0xa4] ss:$8 sps:$4 sm:$0xff]   ;;  %v2459_v22 = vld [vmem:[%s3776_s9 + $0xa0] ss:$8 sps:$4 sm:$0xff]  }
  0x23   :  { %478 = vmatprep.subr.bf16.mxu1 %v2392_v25  ;;  %v2464_v23 = vld [vmem:[%s3776_s9 + $0xb4] ss:$8 sps:$4 sm:$0xff]   ;;  %v2462_v24 = vld [vmem:[%s3776_s9 + $0xb0] ss:$8 sps:$4 sm:$0xff]   ;;  %v2467_v25 = vld [vmem:[%s3776_s9 + $0xc4] ss:$8 sps:$4 sm:$0xff]  }
  0x24   :  { %v2468_v28 = vld [vmem:[%s3776_s9 + $0xd0] ss:$8 sps:$4 sm:$0xff]   ;;  %v2473_v29 = vld [vmem:[%s3776_s9 + $0xe4] ss:$8 sps:$4 sm:$0xff]   ;;  %v2482_v41 = vld [vmem:[%s3776_s9 + $0x114] ss:$8 sps:$4 sm:$0xff]  }
  0x25   :  { %436 = vmatpush1.bf16.msra.mxu0 %v2394_v26  ;;  %v2465_v26 = vld [vmem:[%s3776_s9 + $0xc0] ss:$8 sps:$4 sm:$0xff]   ;;  %v2474_v32 = vld [vmem:[%s3776_s9 + $0xf0] ss:$8 sps:$4 sm:$0xff]   ;;  %v2497_v55 = vld [vmem:[%s3776_s9 + $0x164] ss:$8 sps:$4 sm:$0xff]  }
  0x26   :  { %479 = vmatpush1.bf16.msra.mxu1 %v2395_v27  ;;  %437 = vmatprep.subr.bf16.mxu0 %v2396_v30  ;;  %v2470_v27 = vld [vmem:[%s3776_s9 + $0xd4] ss:$8 sps:$4 sm:$0xff]   ;;  %v2471_v30 = vld [vmem:[%s3776_s9 + $0xe0] ss:$8 sps:$4 sm:$0xff]   ;;  %v2581_v56 = vld [vmem:[%s3772_s5 + $0x24] ss:$8 sps:$4 sm:$0xff]  }
  0x27   :  { %480 = vmatprep.subr.bf16.mxu1 %v2398_v31  ;;  %v2476_v31 = vld [vmem:[%s3776_s9 + $0xf4] ss:$8 sps:$4 sm:$0xff]   ;;  %v2495_v58 = vld [vmem:[%s3776_s9 + $0x160] ss:$8 sps:$4 sm:$0xff]  }
  0x29   :  { %438 = vmatpush1.bf16.msra.mxu0 %v2400_v33  ;;  %v2479_v33 = vld [vmem:[%s3776_s9 + $0x104] ss:$8 sps:$4 sm:$0xff]  }
  0x2a   :  { %481 = vmatpush1.bf16.msra.mxu1 %v2401_v34  ;;  %439 = vmatprep.subr.bf16.mxu0 %v2402_v35  ;;  %v816_v34 = vld [vmem:[%s3797_s2] sm:$0xff]  ;;  %v822_v35 = vld [vmem:[%s3797_s2 + $0x30] sm:$0xff] }
  0x2b   :  { %482 = vmatprep.subr.bf16.mxu1 %v2404_v36  ;;  %v819_v36 = vld [vmem:[%s3797_s2 + $0x18] sm:$0xff] }
  0x2d   :  { %440 = vmatpush1.bf16.msra.mxu0 %v2406_v37  ;;  %v825_v37 = vld [vmem:[%s3797_s2 + $0x48] sm:$0xff] }
  0x2e   :  { %483 = vmatpush1.bf16.msra.mxu1 %v2407_v38  ;;  %441 = vmatprep.subr.bf16.mxu0 %v2408_v39  ;;  %v828_v38 = vpack.c.bf16 %v822_v35, %v816_v34  ;;  %v2477_v39 = vld [vmem:[%s3776_s9 + $0x100] ss:$8 sps:$4 sm:$0xff]   ;;  %v831_v40 = vpack.c.bf16 %v825_v37, %v819_v36 }
  0x2f   :  { %1457 = vmatprep.subr.bf16.mxu1 %v2412_v42  ;;  %v2480_v42 = vld [vmem:[%s3776_s9 + $0x110] ss:$8 sps:$4 sm:$0xff]  }
  0x31   :  { %499 = vmatmul.mubr.bf16.vlgmr.msra.gmra.mrb[0].mxu1 %v70_v43  ;;  %442 = vmatpush1.bf16.msra.mxu0 %v2413_v45  ;;  %v2485_v43 = vld [vmem:[%s3776_s9 + $0x124] ss:$8 sps:$4 sm:$0xff]  }
  0x32   :  { %1458 = vmatpush1.bf16.msra.mxu1 %v2410_v44  ;;  %443 = vmatprep.subr.bf16.mxu0 %v2414_v46  ;;  %v2573_v44 = vld [vmem:[%s3772_s5] ss:$8 sps:$4 sm:$0xff]   ;;  %v2575_v45 = vld [vmem:[%s3772_s5 + $0x4] ss:$8 sps:$4 sm:$0xff]  }
  0x33   :  { %1459 = vmatprep.subr.bf16.mxu1 %v2418_v47  ;;  %1489 = vmatprep.mubr.bf16.mxu1 %v829_v9  ;;  %v2483_v46 = vld [vmem:[%s3776_s9 + $0x120] ss:$8 sps:$4 sm:$0xff]   ;;  %v2576_v47 = vld [vmem:[%s3772_s5 + $0x10] ss:$8 sps:$4 sm:$0xff]  }
  0x35   :  { %444 = vmatpush1.bf16.msra.mxu0 %v2419_v49  ;;  %v2488_v49 = vld [vmem:[%s3776_s9 + $0x134] ss:$8 sps:$4 sm:$0xff]  }
  0x36   :  { %1460 = vmatpush1.bf16.msra.mxu1 %v2416_v48  ;;  %445 = vmatprep.subr.bf16.mxu0 %v2420_v50  ;;  %v2578_v48 = vld [vmem:[%s3772_s5 + $0x14] ss:$8 sps:$4 sm:$0xff]   ;;  %v2486_v50 = vld [vmem:[%s3776_s9 + $0x130] ss:$8 sps:$4 sm:$0xff]  }
  0x37   :  { %1461 = vmatprep.subr.bf16.mxu1 %v2424_v51  ;;  %v2491_v51 = vld [vmem:[%s3776_s9 + $0x144] ss:$8 sps:$4 sm:$0xff]  }
  0x39   :  { %446 = vmatpush1.bf16.msra.mxu0 %v2425_v53  ;;  %v2494_v53 = vld [vmem:[%s3776_s9 + $0x154] ss:$8 sps:$4 sm:$0xff]  }
  0x3a   :  { %1462 = vmatpush1.bf16.msra.mxu1 %v2422_v52  ;;  %447 = vmatprep.subr.bf16.mxu0 %v2426_v54  ;;  %v2489_v52 = vld [vmem:[%s3776_s9 + $0x140] ss:$8 sps:$4 sm:$0xff]   ;;  %v2492_v54 = vld [vmem:[%s3776_s9 + $0x150] ss:$8 sps:$4 sm:$0xff]  }
  0x3b   :  { %1463 = vmatprep.subr.bf16.mxu1 %v2430_v57  ;;  %v2579_v57 = vld [vmem:[%s3772_s5 + $0x20] ss:$8 sps:$4 sm:$0xff]  }
  0x3d   :  { %448 = vmatpush1.bf16.msra.mxu0 %v2431_v60  ;;  %v2500_v60 = vld [vmem:[%s3776_s9 + $0x174] ss:$8 sps:$4 sm:$0xff]  }
  0x3e   :  { %1464 = vmatpush1.bf16.msra.mxu1 %v2428_v59  ;;  %449 = vmatprep.subr.bf16.mxu0 %v2432_v61  ;;  %v2584_v59 = vld [vmem:[%s3772_s5 + $0x34] ss:$8 sps:$4 sm:$0xff]   ;;  %v2582_v61 = vld [vmem:[%s3772_s5 + $0x30] ss:$8 sps:$4 sm:$0xff]  }
  0x3f   :  { %1465 = vmatprep.subr.bf16.mxu1 %v2436_v62  ;;  %v2587_v62 = vld [vmem:[%s3772_s5 + $0x44] ss:$8 sps:$4 sm:$0xff]  }
  0x41   :  { %450 = vmatpush1.bf16.msra.mxu0 %v2437_v0  ;;  %v2498_v0 = vld [vmem:[%s3776_s9 + $0x170] ss:$8 sps:$4 sm:$0xff]  }
  0x42   :  { %1466 = vmatpush1.bf16.msra.mxu1 %v2434_v63  ;;  %451 = vmatprep.subr.bf16.mxu0 %v2438_v1  ;;  %v2585_v63 = vld [vmem:[%s3772_s5 + $0x40] ss:$8 sps:$4 sm:$0xff]   ;;  %v2503_v1 = vld [vmem:[%s3776_s9 + $0x184] ss:$8 sps:$4 sm:$0xff]  }
  0x43   :  { %1467 = vmatprep.subr.bf16.mxu1 %v2442_v2  ;;  %v2590_v2 = vld [vmem:[%s3772_s5 + $0x54] ss:$8 sps:$4 sm:$0xff]  }
  0x45   :  { %452 = vmatpush1.bf16.msra.mxu0 %v2443_v4 }
  0x46   :  { %1468 = vmatpush1.bf16.msra.mxu1 %v2440_v3  ;;  %453 = vmatprep.subr.bf16.mxu0 %v2444_v5  ;;  %v2588_v3 = vld [vmem:[%s3772_s5 + $0x50] ss:$8 sps:$4 sm:$0xff]  }
  0x47   :  { %1469 = vmatprep.subr.bf16.mxu1 %v2448_v6 }
  0x49   :  { %454 = vmatpush1.bf16.msra.mxu0 %v2449_v11 }
  0x4a   :  { %1470 = vmatpush1.bf16.msra.mxu1 %v2446_v10  ;;  %702 = vmatprep.subr.bf16.mxu0 %v2575_v45 }
  0x4b   :  { %1471 = vmatprep.subr.bf16.mxu1 %v2452_v14 }
  0x4c   :  { %456 = vmatmul.mubr.bf16.vlgmr.msra.gmra.mrb[0].mxu0 %v68_v15 }
  0x4d   :  { %703 = vmatpush1.bf16.msra.mxu0 %v2573_v44 }
  0x4e   :  { %1472 = vmatpush1.bf16.msra.mxu1 %v2450_v16  ;;  %704 = vmatprep.subr.bf16.mxu0 %v2578_v48 }
  0x4f   :  { %1473 = vmatprep.subr.bf16.mxu1 %v2455_v17 }
  0x51   :  { %705 = vmatpush1.bf16.msra.mxu0 %v2576_v47 }
  0x52   :  { %1474 = vmatpush1.bf16.msra.mxu1 %v2453_v18  ;;  %706 = vmatprep.subr.bf16.mxu0 %v2581_v56 }
  0x53   :  { %1475 = vmatprep.subr.bf16.mxu1 %v2458_v19 }
  0x55   :  { %707 = vmatpush1.bf16.msra.mxu0 %v2579_v57 }
  0x56   :  { %1476 = vmatpush1.bf16.msra.mxu1 %v2456_v20  ;;  %708 = vmatprep.subr.bf16.mxu0 %v2584_v59 }
  0x57   :  { %1477 = vmatprep.subr.bf16.mxu1 %v2461_v21 }
  0x59   :  { %709 = vmatpush1.bf16.msra.mxu0 %v2582_v61 }
  0x5a   :  { %1478 = vmatpush1.bf16.msra.mxu1 %v2459_v22  ;;  %710 = vmatprep.subr.bf16.mxu0 %v2587_v62 }
  0x5b   :  { %1479 = vmatprep.subr.bf16.mxu1 %v2464_v23 }
  0x5d   :  { %711 = vmatpush1.bf16.msra.mxu0 %v2585_v63 }
  0x5e   :  { %1480 = vmatpush1.bf16.msra.mxu1 %v2462_v24 }
  0x5f   :  { %1481 = vmatprep.subr.bf16.mxu1 %v2467_v25 }
  0x62   :  { %1482 = vmatpush1.bf16.msra.mxu1 %v2465_v26 }
  0x63   :  { %1483 = vmatprep.subr.bf16.mxu1 %v2470_v27 }
  0x66   :  { %1484 = vmatpush1.bf16.msra.mxu1 %v2468_v28 }
  0x67   :  { %1485 = vmatprep.subr.bf16.mxu1 %v2473_v29 }
  0x6a   :  { %1486 = vmatpush1.bf16.msra.mxu1 %v2471_v30 }
  0x6b   :  { %1487 = vmatprep.subr.bf16.mxu1 %v2476_v31 }
  0x6e   :  { %1488 = vmatpush1.bf16.msra.mxu1 %v2474_v32 }
  0x6f   :  { %1500 = vmatprep.subr.bf16.mxu1 %v2479_v33 }
  0x71   :  { %1490 = vmatmul.mubr.bf16.vlgmr.msra.gmra.mrb[4].mxu1 %v828_v38 }
  0x72   :  { %1501 = vmatpush1.bf16.msra.mxu1 %v2477_v39  ;;  %1532 = vmatprep.mubr.bf16.mxu1 %v831_v40 }
  0x73   :  { %1502 = vmatprep.subr.bf16.mxu1 %v2482_v41 }
  0x76   :  { %1503 = vmatpush1.bf16.msra.mxu1 %v2480_v42 }
  0x77   :  { %1504 = vmatprep.subr.bf16.mxu1 %v2485_v43 }
  0x7a   :  { %1505 = vmatpush1.bf16.msra.mxu1 %v2483_v46 }
  0x7b   :  { %1506 = vmatprep.subr.bf16.mxu1 %v2488_v49 }
  0x7e   :  { %1507 = vmatpush1.bf16.msra.mxu1 %v2486_v50 }
  0x7f   :  { %1508 = vmatprep.subr.bf16.mxu1 %v2491_v51 }
  0x82   :  { %1509 = vmatpush1.bf16.msra.mxu1 %v2489_v52 }
  0x83   :  { %1510 = vmatprep.subr.bf16.mxu1 %v2494_v53 }
  0x86   :  { %1511 = vmatpush1.bf16.msra.mxu1 %v2492_v54 }
  0x87   :  { %1512 = vmatprep.subr.bf16.mxu1 %v2497_v55 }
  0x8a   :  { %1513 = vmatpush1.bf16.msra.mxu1 %v2495_v58 }
  0x8b   :  { %1514 = vmatprep.subr.bf16.mxu1 %v2500_v60 }
  0x8c   :  { %26 = vsyncpa [#allocation5], 0  ;;  %v2501_v4 = vld [vmem:[%s3776_s9 + $0x180] ss:$8 sps:$4 sm:$0xff]   ;;  %712 = vmatprep.subr.bf16.mxu0 %v2590_v2  ;;  %v2593_v5 = vld [vmem:[%s3772_s5 + $0x64] ss:$8 sps:$4 sm:$0xff]  }
  0x8d   :  { %v2506_v6 = vld [vmem:[%s3776_s9 + $0x194] ss:$8 sps:$4 sm:$0xff]   ;;  %713 = vmatpush1.bf16.msra.mxu0 %v2588_v3  ;;  %v2591_v7 = vld [vmem:[%s3772_s5 + $0x60] ss:$8 sps:$4 sm:$0xff]   ;;  %v2504_v8 = vld [vmem:[%s3776_s9 + $0x190] ss:$8 sps:$4 sm:$0xff]  }
  0x8e   :  { %1515 = vmatpush1.bf16.msra.mxu1 %v2498_v0  ;;  %714 = vmatprep.subr.bf16.mxu0 %v2593_v5  ;;  %v2596_v9 = vld [vmem:[%s3772_s5 + $0x74] ss:$8 sps:$4 sm:$0xff]   ;;  %v2509_v10 = vld [vmem:[%s3776_s9 + $0x1a4] ss:$8 sps:$4 sm:$0xff]   ;;  %v2594_v11 = vld [vmem:[%s3772_s5 + $0x70] ss:$8 sps:$4 sm:$0xff]  }
  0x8f   :  { %1516 = vmatprep.subr.bf16.mxu1 %v2503_v1  ;;  %v2507_v12 = vld [vmem:[%s3776_s9 + $0x1a0] ss:$8 sps:$4 sm:$0xff]   ;;  %v2599_v13 = vld [vmem:[%s3772_s5 + $0x84] ss:$8 sps:$4 sm:$0xff]   ;;  %v2512_v14 = vld [vmem:[%s3776_s9 + $0x1b4] ss:$8 sps:$4 sm:$0xff]  }
  0x90   :  { %v2597_v15 = vld [vmem:[%s3772_s5 + $0x80] ss:$8 sps:$4 sm:$0xff]   ;;  %v2510_v16 = vld [vmem:[%s3776_s9 + $0x1b0] ss:$8 sps:$4 sm:$0xff]   ;;  %v2515_v17 = vld [vmem:[%s3776_s9 + $0x1c4] ss:$8 sps:$4 sm:$0xff]  }
  0x91   :  { %715 = vmatpush1.bf16.msra.mxu0 %v2591_v7  ;;  %v2513_v18 = vld [vmem:[%s3776_s9 + $0x1c0] ss:$8 sps:$4 sm:$0xff]   ;;  %v2602_v19 = vld [vmem:[%s3772_s5 + $0x94] ss:$8 sps:$4 sm:$0xff]   ;;  %v2600_v21 = vld [vmem:[%s3772_s5 + $0x90] ss:$8 sps:$4 sm:$0xff]  }
  0x92   :  { %1517 = vmatpush1.bf16.msra.mxu1 %v2501_v4  ;;  %716 = vmatprep.subr.bf16.mxu0 %v2596_v9  ;;  %v2518_v20 = vld [vmem:[%s3776_s9 + $0x1d4] ss:$8 sps:$4 sm:$0xff]   ;;  %v2516_v22 = vld [vmem:[%s3776_s9 + $0x1d0] ss:$8 sps:$4 sm:$0xff]   ;;  %v2605_v23 = vld [vmem:[%s3772_s5 + $0xa4] ss:$8 sps:$4 sm:$0xff]  }
  0x93   :  { %1518 = vmatprep.subr.bf16.mxu1 %v2506_v6  ;;  %v2521_v24 = vld [vmem:[%s3776_s9 + $0x1e4] ss:$8 sps:$4 sm:$0xff]   ;;  %v2603_v25 = vld [vmem:[%s3772_s5 + $0xa0] ss:$8 sps:$4 sm:$0xff]   ;;  %v2608_v27 = vld [vmem:[%s3772_s5 + $0xb4] ss:$8 sps:$4 sm:$0xff]  }
  0x94   :  { %v2519_v26 = vld [vmem:[%s3776_s9 + $0x1e0] ss:$8 sps:$4 sm:$0xff]   ;;  %v2524_v28 = vld [vmem:[%s3776_s9 + $0x1f4] ss:$8 sps:$4 sm:$0xff]   ;;  %v2606_v29 = vld [vmem:[%s3772_s5 + $0xb0] ss:$8 sps:$4 sm:$0xff]  }
  0x95   :  { %717 = vmatpush1.bf16.msra.mxu0 %v2594_v11  ;;  %v2522_v30 = vld [vmem:[%s3776_s9 + $0x1f0] ss:$8 sps:$4 sm:$0xff]   ;;  %v2527_v31 = vld [vmem:[%s3776_s9 + $0x204] ss:$8 sps:$4 sm:$0xff]   ;;  %v2609_v37 = vld [vmem:[%s3772_s5 + $0xc0] ss:$8 sps:$4 sm:$0xff]  }
  0x96   :  { %1519 = vmatpush1.bf16.msra.mxu1 %v2504_v8  ;;  %718 = vmatprep.subr.bf16.mxu0 %v2599_v13  ;;  %v818_v32 = vld [vmem:[%s3797_s2 + $0x10] sm:$0xff]  ;;  %v824_v33 = vld [vmem:[%s3797_s2 + $0x40] sm:$0xff]  ;;  %v821_v35 = vld [vmem:[%s3797_s2 + $0x28] sm:$0xff]  ;;  %vm1962_vm1 = vcmask 0  }
  0x97   :  { %1520 = vmatprep.subr.bf16.mxu1 %v2509_v10  ;;  %v2611_v34 = vld [vmem:[%s3772_s5 + $0xc4] ss:$8 sps:$4 sm:$0xff]   ;;  %v827_v36 = vld [vmem:[%s3797_s2 + $0x58] sm:$0xff]  ;;  %v830_v38 = vpack.c.bf16 %v824_v33, %v818_v32  ;;  %v2525_v39 = vld [vmem:[%s3776_s9 + $0x200] ss:$8 sps:$4 sm:$0xff]  }
  0x98   :  { %v833_v40 = vpack.c.bf16 %v827_v36, %v821_v35  ;;  %v2614_v41 = vld [vmem:[%s3772_s5 + $0xd4] ss:$8 sps:$4 sm:$0xff]   ;;  %v2612_v43 = vld [vmem:[%s3772_s5 + $0xd0] ss:$8 sps:$4 sm:$0xff]   ;;  %v2617_v45 = vld [vmem:[%s3772_s5 + $0xe4] ss:$8 sps:$4 sm:$0xff]  }
  0x99   :  { %719 = vmatpush1.bf16.msra.mxu0 %v2597_v15  ;;  %v2530_v42 = vld [vmem:[%s3776_s9 + $0x214] ss:$8 sps:$4 sm:$0xff]   ;;  %v2528_v44 = vld [vmem:[%s3776_s9 + $0x210] ss:$8 sps:$4 sm:$0xff]   ;;  %v2533_v46 = vld [vmem:[%s3776_s9 + $0x224] ss:$8 sps:$4 sm:$0xff]  }
  0x9a   :  { %1521 = vmatpush1.bf16.msra.mxu1 %v2507_v12  ;;  %720 = vmatprep.subr.bf16.mxu0 %v2602_v19  ;;  %v2615_v47 = vld [vmem:[%s3772_s5 + $0xe0] ss:$8 sps:$4 sm:$0xff]   ;;  %v2618_v49 = vld [vmem:[%s3772_s5 + $0xf0] ss:$8 sps:$4 sm:$0xff]   ;;  %v2620_v50 = vld [vmem:[%s3772_s5 + $0xf4] ss:$8 sps:$4 sm:$0xff]  }
  0x9b   :  { %1522 = vmatprep.subr.bf16.mxu1 %v2512_v14  ;;  %v2531_v48 = vld [vmem:[%s3776_s9 + $0x220] ss:$8 sps:$4 sm:$0xff]   ;;  %v2536_v51 = vld [vmem:[%s3776_s9 + $0x234] ss:$8 sps:$4 sm:$0xff]   ;;  %v2534_v52 = vld [vmem:[%s3776_s9 + $0x230] ss:$8 sps:$4 sm:$0xff]  }
  0x9c   :  { %v2539_v53 = vld [vmem:[%s3776_s9 + $0x244] ss:$8 sps:$4 sm:$0xff]   ;;  %v2537_v55 = vld [vmem:[%s3776_s9 + $0x240] ss:$8 sps:$4 sm:$0xff]   ;;  %v2542_v56 = vld [vmem:[%s3776_s9 + $0x254] ss:$8 sps:$4 sm:$0xff]  }
  0x9d   :  { %721 = vmatpush1.bf16.msra.mxu0 %v2600_v21  ;;  %v2623_v54 = vld [vmem:[%s3778_s11 + $0x4] ss:$8 sps:$4 sm:$0xff]   ;;  %v2540_v57 = vld [vmem:[%s3776_s9 + $0x250] ss:$8 sps:$4 sm:$0xff]   ;;  %v2543_v59 = vld [vmem:[%s3776_s9 + $0x260] ss:$8 sps:$4 sm:$0xff]   ;;  %v159_v21 = vlaneseq }
  0x9e   :  { %1523 = vmatpush1.bf16.msra.mxu1 %v2510_v16  ;;  %722 = vmatprep.subr.bf16.mxu0 %v2605_v23  ;;  %v2545_v58 = vld [vmem:[%s3776_s9 + $0x264] ss:$8 sps:$4 sm:$0xff]   ;;  %v2548_v60 = vld [vmem:[%s3776_s9 + $0x274] ss:$8 sps:$4 sm:$0xff]   ;;  %v2546_v61 = vld [vmem:[%s3776_s9 + $0x270] ss:$8 sps:$4 sm:$0xff]  }
  0x9f   :  { %1524 = vmatprep.subr.bf16.mxu1 %v2515_v17  ;;  %v2551_v62 = vld [vmem:[%s3776_s9 + $0x284] ss:$8 sps:$4 sm:$0xff]   ;;  %v2549_v63 = vld [vmem:[%s3776_s9 + $0x280] ss:$8 sps:$4 sm:$0xff]   ;;  %v2554_v0 = vld [vmem:[%s3776_s9 + $0x294] ss:$8 sps:$4 sm:$0xff]  }
  0xa0   :  { %v2552_v1 = vld [vmem:[%s3776_s9 + $0x290] ss:$8 sps:$4 sm:$0xff]   ;;  %v2557_v2 = vld [vmem:[%s3776_s9 + $0x2a4] ss:$8 sps:$4 sm:$0xff]   ;;  %v2555_v3 = vld [vmem:[%s3776_s9 + $0x2a0] ss:$8 sps:$4 sm:$0xff]  }
  0xa1   :  { %723 = vmatpush1.bf16.msra.mxu0 %v2603_v25  ;;  %v2560_v4 = vld [vmem:[%s3776_s9 + $0x2b4] ss:$8 sps:$4 sm:$0xff]   ;;  %v2558_v5 = vld [vmem:[%s3776_s9 + $0x2b0] ss:$8 sps:$4 sm:$0xff]   ;;  %v2563_v6 = vld [vmem:[%s3776_s9 + $0x2c4] ss:$8 sps:$4 sm:$0xff]  }
  0xa2   :  { %1525 = vmatpush1.bf16.msra.mxu1 %v2513_v18  ;;  %724 = vmatprep.subr.bf16.mxu0 %v2608_v27  ;;  %v2561_v7 = vld [vmem:[%s3776_s9 + $0x2c0] ss:$8 sps:$4 sm:$0xff]   ;;  %v2566_v8 = vld [vmem:[%s3776_s9 + $0x2d4] ss:$8 sps:$4 sm:$0xff]   ;;  %v2564_v9 = vld [vmem:[%s3776_s9 + $0x2d0] ss:$8 sps:$4 sm:$0xff]  }
  0xa3   :  { %1526 = vmatprep.subr.bf16.mxu1 %v2518_v20  ;;  %v2569_v10 = vld [vmem:[%s3776_s9 + $0x2e4] ss:$8 sps:$4 sm:$0xff]   ;;  %v2567_v11 = vld [vmem:[%s3776_s9 + $0x2e0] ss:$8 sps:$4 sm:$0xff]   ;;  %v2572_v12 = vld [vmem:[%s3776_s9 + $0x2f4] ss:$8 sps:$4 sm:$0xff]  }
  0xa4   :  { %v2570_v13 = vld [vmem:[%s3776_s9 + $0x2f0] ss:$8 sps:$4 sm:$0xff]   ;;  %v820_v14 = vld [vmem:[%s3797_s2 + $0x20] sm:$0xff] }
  0xa5   :  { %725 = vmatpush1.bf16.msra.mxu0 %v2606_v29  ;;  %v826_v15 = vld [vmem:[%s3797_s2 + $0x50] sm:$0xff] }
  0xa6   :  { %1527 = vmatpush1.bf16.msra.mxu1 %v2516_v22  ;;  %726 = vmatprep.subr.bf16.mxu0 %v2611_v34  ;;  %v832_v16 = vpack.c.bf16 %v826_v15, %v820_v14  ;;  %v160_v22 = vshrl.u32 %v159_v21, 7  ;;  %v2645_v14 = vld [vmem:[%s3778_s11 + $0x80] ss:$8 sps:$4 sm:$0xff]   ;;  %v2650_v15 = vld [vmem:[%s3778_s11 + $0x94] ss:$8 sps:$4 sm:$0xff]  }
  0xa7   :  { %1528 = vmatprep.subr.bf16.mxu1 %v2521_v24  ;;  %v122_v24 = vld [vmem:[%s3771_s4] sm:$0x3]  ;;  %v2659_v21 = vld [vmem:[%s3778_s11 + $0xc4] ss:$8 sps:$4 sm:$0xff]  }
  0xa8   :  { %v3467_v23 = vsub.s32 0, %v160_v22  ;;  %v3472_v25 = vsub.s32 1, %v160_v22  ;;  %v2657_v22 = vld [vmem:[%s3778_s11 + $0xc0] ss:$8 sps:$4 sm:$0xff]  }
  0xa9   :  { %727 = vmatpush1.bf16.msra.mxu0 %v2609_v37 }
  0xaa   :  { %1529 = vmatpush1.bf16.msra.mxu1 %v2519_v26  ;;  %728 = vmatprep.subr.bf16.mxu0 %v2614_v41  ;;  %v162_v26 = vrot.slane %v122_v24, %v3467_v23  ;;  %v166_v27 = vrot.slane %v122_v24, %v3472_v25  ;;  %v2662_v24 = vld [vmem:[%s3778_s11 + $0xd4] ss:$8 sps:$4 sm:$0xff]  }
  0xab   :  { %1530 = vmatprep.subr.bf16.mxu1 %v2524_v28 }
  0xad   :  { %729 = vmatpush1.bf16.msra.mxu0 %v2612_v43 }
  0xae   :  { %1531 = vmatpush1.bf16.msra.mxu1 %v2522_v30  ;;  %730 = vmatprep.subr.bf16.mxu0 %v2617_v45 }
  0xaf   :  { %1543 = vmatprep.subr.bf16.mxu1 %v2527_v31 }
  0xb1   :  { %1533 = vmatmul.mubr.bf16.vlgmr.msra.gmra.mrb[4].mxu1 %v830_v38  ;;  %731 = vmatpush1.bf16.msra.mxu0 %v2615_v47 }
  0xb2   :  { %1544 = vmatpush1.bf16.msra.mxu1 %v2525_v39  ;;  %1575 = vmatprep.mubr.bf16.mxu1 %v833_v40 }
  0xb3   :  { %1545 = vmatprep.subr.bf16.mxu1 %v2530_v42  ;;  %732 = vmatprep.subr.bf16.mxu0 %v2620_v50 }
  0xb5   :  { %733 = vmatpush1.bf16.msra.mxu0 %v2618_v49 }
  0xb6   :  { %1546 = vmatpush1.bf16.msra.mxu1 %v2528_v44  ;;  %1779 = vmatprep.subr.bf16.mxu0 %v2623_v54 }
  0xb7   :  { %1547 = vmatprep.subr.bf16.mxu1 %v2533_v46 }
  0xba   :  { %1548 = vmatpush1.bf16.msra.mxu1 %v2531_v48 }
  0xbb   :  { %1549 = vmatprep.subr.bf16.mxu1 %v2536_v51 }
  0xbe   :  { %1550 = vmatpush1.bf16.msra.mxu1 %v2534_v52 }
  0xbf   :  { %1551 = vmatprep.subr.bf16.mxu1 %v2539_v53 }
  0xc2   :  { %1552 = vmatpush1.bf16.msra.mxu1 %v2537_v55 }
  0xc3   :  { %1553 = vmatprep.subr.bf16.mxu1 %v2542_v56 }
  0xc6   :  { %1554 = vmatpush1.bf16.msra.mxu1 %v2540_v57 }
  0xc7   :  { %1555 = vmatprep.subr.bf16.mxu1 %v2545_v58 }
  0xca   :  { %1556 = vmatpush1.bf16.msra.mxu1 %v2543_v59 }
  0xcb   :  { %1557 = vmatprep.subr.bf16.mxu1 %v2548_v60 }
  0xce   :  { %1558 = vmatpush1.bf16.msra.mxu1 %v2546_v61  ;;  %v2621_v61 = vld [vmem:[%s3778_s11] ss:$8 sps:$4 sm:$0xff]  }
  0xcf   :  { %1559 = vmatprep.subr.bf16.mxu1 %v2551_v62 }
  0xd2   :  { %1560 = vmatpush1.bf16.msra.mxu1 %v2549_v63  ;;  %v2626_v63 = vld [vmem:[%s3778_s11 + $0x14] ss:$8 sps:$4 sm:$0xff]  }
  0xd3   :  { %1561 = vmatprep.subr.bf16.mxu1 %v2554_v0  ;;  %v2624_v0 = vld [vmem:[%s3778_s11 + $0x10] ss:$8 sps:$4 sm:$0xff]  }
  0xd6   :  { %1562 = vmatpush1.bf16.msra.mxu1 %v2552_v1  ;;  %v2629_v1 = vld [vmem:[%s3778_s11 + $0x24] ss:$8 sps:$4 sm:$0xff]  }
  0xd7   :  { %1563 = vmatprep.subr.bf16.mxu1 %v2557_v2  ;;  %v2627_v2 = vld [vmem:[%s3778_s11 + $0x20] ss:$8 sps:$4 sm:$0xff]  }
  0xda   :  { %1564 = vmatpush1.bf16.msra.mxu1 %v2555_v3  ;;  %v2632_v3 = vld [vmem:[%s3778_s11 + $0x34] ss:$8 sps:$4 sm:$0xff]  }
  0xdb   :  { %1565 = vmatprep.subr.bf16.mxu1 %v2560_v4  ;;  %v2630_v4 = vld [vmem:[%s3778_s11 + $0x30] ss:$8 sps:$4 sm:$0xff]  }
  0xde   :  { %1566 = vmatpush1.bf16.msra.mxu1 %v2558_v5  ;;  %v2635_v5 = vld [vmem:[%s3778_s11 + $0x44] ss:$8 sps:$4 sm:$0xff]  }
  0xdf   :  { %1567 = vmatprep.subr.bf16.mxu1 %v2563_v6  ;;  %v2633_v6 = vld [vmem:[%s3778_s11 + $0x40] ss:$8 sps:$4 sm:$0xff]  }
  0xe2   :  { %1568 = vmatpush1.bf16.msra.mxu1 %v2561_v7  ;;  %v2638_v7 = vld [vmem:[%s3778_s11 + $0x54] ss:$8 sps:$4 sm:$0xff]  }
  0xe3   :  { %1569 = vmatprep.subr.bf16.mxu1 %v2566_v8  ;;  %v2636_v8 = vld [vmem:[%s3778_s11 + $0x50] ss:$8 sps:$4 sm:$0xff]  }
  0xe6   :  { %1570 = vmatpush1.bf16.msra.mxu1 %v2564_v9  ;;  %v2641_v9 = vld [vmem:[%s3778_s11 + $0x64] ss:$8 sps:$4 sm:$0xff]  }
  0xe7   :  { %1571 = vmatprep.subr.bf16.mxu1 %v2569_v10  ;;  %v2639_v10 = vld [vmem:[%s3778_s11 + $0x60] ss:$8 sps:$4 sm:$0xff]  }
  0xea   :  { %1572 = vmatpush1.bf16.msra.mxu1 %v2567_v11  ;;  %v2644_v11 = vld [vmem:[%s3778_s11 + $0x74] ss:$8 sps:$4 sm:$0xff]  }
  0xeb   :  { %1573 = vmatprep.subr.bf16.mxu1 %v2572_v12  ;;  %v2642_v12 = vld [vmem:[%s3778_s11 + $0x70] ss:$8 sps:$4 sm:$0xff]  }
  0xee   :  { %1574 = vmatpush1.bf16.msra.mxu1 %v2570_v13  ;;  %v2647_v13 = vld [vmem:[%s3778_s11 + $0x84] ss:$8 sps:$4 sm:$0xff]  }
  0xf1   :  { %1576 = vmatmul.mubr.bf16.vlgmr.msra.gmra.mrb[4].mxu1 %v832_v16  ;;  %v2648_v16 = vld [vmem:[%s3778_s11 + $0x90] ss:$8 sps:$4 sm:$0xff]  }
 0x104   :  { %v500_v17 = vpop.f32.mrb[0].mxu1 }
 0x105   :  { %v502_v18 = vpop.f32.mrb[1].mxu1 }
 0x106   :  { %v504_v19 = vpop.f32.mrb[2].mxu1 }
 0x107   :  { %v506_v20 = vpop.f32.mrb[3].mxu1 }
 0x11f   :  { %v457_v28 = vpop.f32.mrb[0].mxu0 }
 0x120   :  { %v458_v29 = vadd.f32 %v457_v28, %v162_v26  ;;  %v459_v30 = vpop.f32.mrb[1].mxu0  ;;  %v2663_v28 = vld [vmem:[%s3778_s11 + $0xe0] ss:$8 sps:$4 sm:$0xff]  }
 0x121   :  { %v460_v31 = vadd.f32 %v459_v30, %v166_v27  ;;  %v461_v32 = vpop.f32.mrb[2].mxu0  ;;  %v2666_v30 = vld [vmem:[%s3778_s11 + $0xf0] ss:$8 sps:$4 sm:$0xff]  }
 0x122   :  { %v3476_v33 = vadd.f32 %v500_v17, %v458_v29  ;;  %v462_v34 = vadd.f32 %v461_v32, %v162_v26  ;;  %v463_v35 = vpop.f32.mrb[3].mxu0  ;;  %v2653_v17 = vld [vmem:[%s3778_s11 + $0xa4] ss:$8 sps:$4 sm:$0xff]   ;;  %v2660_v26 = vld [vmem:[%s3778_s11 + $0xd0] ss:$8 sps:$4 sm:$0xff]  }
 0x123   :  { %v3478_v36 = vadd.f32 %v502_v18, %v460_v31  ;;  %v464_v37 = vadd.f32 %v463_v35, %v166_v27  ;;  %v2651_v18 = vld [vmem:[%s3778_s11 + $0xa0] ss:$8 sps:$4 sm:$0xff]   ;;  %v2665_v27 = vld [vmem:[%s3778_s11 + $0xe4] ss:$8 sps:$4 sm:$0xff]   ;;  %v2668_v29 = vld [vmem:[%s3778_s11 + $0xf4] ss:$8 sps:$4 sm:$0xff]  }
 0x124   :  { %v513_v38 = vmul.f32 0.70710677, %v3476_v33  ;;  %v3481_v39 = vadd.f32 %v504_v19, %v462_v34  ;;  %v509_v55 = vmul.f32 0.5, %v3476_v33  ;;  %v2656_v19 = vld [vmem:[%s3778_s11 + $0xb4] ss:$8 sps:$4 sm:$0xff]  }
 0x125   :  { %v514_v40 = vmul.f32 0.70710677, %v3478_v36  ;;  %v3484_v41 = vadd.f32 %v506_v20, %v464_v37  ;;  %v510_v52 = vmul.f32 0.5, %v3478_v36  ;;  %v2654_v20 = vld [vmem:[%s3778_s11 + $0xb0] ss:$8 sps:$4 sm:$0xff]  }
 0x126   :  { %2669 = verf.f32 %v513_v38  ;;  %v515_v42 = vmul.f32 0.70710677, %v3481_v39  ;;  %v511_v50 = vmul.f32 0.5, %v3481_v39  ;;  %v930_v31 = vld [vmem:[%s3777_s10] sm:$0x3] }
 0x127   :  { %2671 = verf.f32 %v514_v40  ;;  %v516_v43 = vmul.f32 0.70710677, %v3484_v41  ;;  %v512_v53 = vmul.f32 0.5, %v3484_v41  ;;  %v970_v32 = vrot.slane %v930_v31, %v3467_v23 }
 0x128   :  { %2673 = verf.f32 %v515_v42  ;;  %v974_v34 = vrot.slane %v930_v31, %v3472_v25 }
 0x129   :  { %2675 = verf.f32 %v516_v43 }
 0x130   :  { %v2670_v44 = vpop.eup %2669 }
 0x131   :  { %v2672_v45 = vpop.eup %2671  ;;  %v521_v49 = vadd.f32 1.0, %v2670_v44 }
 0x132   :  { %v2674_v46 = vpop.eup %2673  ;;  %v522_v47 = vadd.f32 1.0, %v2672_v45 }
 0x133   :  { %v2676_v48 = vpop.eup %2675  ;;  %v523_v51 = vadd.f32 1.0, %v2674_v46  ;;  %v525_v59 = vmul.f32 %v521_v49, %v509_v55 }
 0x134   :  { %v524_v54 = vadd.f32 1.0, %v2676_v48  ;;  %v526_v57 = vmul.f32 %v522_v47, %v510_v52 }
 0x135   :  { %v527_v56 = vmul.f32 %v523_v51, %v511_v50 }
 0x136   :  { %v528_v58 = vmul.f32 %v524_v54, %v512_v53 }
 0x137   :  { %v529_v62 = vpack.c.bf16 %v527_v56, %v525_v59 }
 0x138   :  { %v530_v60 = vpack.c.bf16 %v528_v58, %v526_v57 }
 0x13a   :  { %734 = vmatprep.mubr.bf16.mxu0 %v530_v60 }
 0x13b   :  { %735 = vmatmul.mubr.bf16.vlgmr.msra.gmra.mrb[4].mxu0 %v529_v62 }
 0x13c   :  { %1780 = vmatpush1.bf16.msra.mxu0 %v2621_v61 }
 0x13d   :  { %1781 = vmatprep.subr.bf16.mxu0 %v2626_v63 }
 0x140   :  { %1782 = vmatpush1.bf16.msra.mxu0 %v2624_v0 }
 0x141   :  { %1783 = vmatprep.subr.bf16.mxu0 %v2629_v1 }
 0x144   :  { %1784 = vmatpush1.bf16.msra.mxu0 %v2627_v2 }
 0x145   :  { %1785 = vmatprep.subr.bf16.mxu0 %v2632_v3 }
 0x148   :  { %1786 = vmatpush1.bf16.msra.mxu0 %v2630_v4  ;;  %v155_v4 = vld [vmem:[%s3773_s6] sm:$0x3] }
 0x149   :  { %1787 = vmatprep.subr.bf16.mxu0 %v2635_v5  ;;  %v535_v5 = vrot.slane %v155_v4, %v3467_v23 }
 0x14c   :  { %1788 = vmatpush1.bf16.msra.mxu0 %v2633_v6  ;;  %v539_v6 = vrot.slane %v155_v4, %v3472_v25 }
 0x14d   :  { %1789 = vmatprep.subr.bf16.mxu0 %v2638_v7 }
 0x150   :  { %1790 = vmatpush1.bf16.msra.mxu0 %v2636_v8 }
 0x151   :  { %1791 = vmatprep.subr.bf16.mxu0 %v2641_v9 }
 0x154   :  { %1792 = vmatpush1.bf16.msra.mxu0 %v2639_v10 }
 0x155   :  { %1793 = vmatprep.subr.bf16.mxu0 %v2644_v11 }
 0x158   :  { %1794 = vmatpush1.bf16.msra.mxu0 %v2642_v12 }
 0x159   :  { %1795 = vmatprep.subr.bf16.mxu0 %v2647_v13 }
 0x15c   :  { %1796 = vmatpush1.bf16.msra.mxu0 %v2645_v14 }
 0x15d   :  { %1797 = vmatprep.subr.bf16.mxu0 %v2650_v15 }
 0x160   :  { %1798 = vmatpush1.bf16.msra.mxu0 %v2648_v16 }
 0x161   :  { %1799 = vmatprep.subr.bf16.mxu0 %v2653_v17 }
 0x164   :  { %1800 = vmatpush1.bf16.msra.mxu0 %v2651_v18 }
 0x165   :  { %1801 = vmatprep.subr.bf16.mxu0 %v2656_v19 }
 0x168   :  { %1802 = vmatpush1.bf16.msra.mxu0 %v2654_v20 }
 0x169   :  { %1803 = vmatprep.subr.bf16.mxu0 %v2659_v21 }
 0x16c   :  { %1804 = vmatpush1.bf16.msra.mxu0 %v2657_v22 }
 0x16d   :  { %1805 = vmatprep.subr.bf16.mxu0 %v2662_v24 }
 0x170   :  { %1806 = vmatpush1.bf16.msra.mxu0 %v2660_v26 }
 0x171   :  { %1807 = vmatprep.subr.bf16.mxu0 %v2665_v27 }
 0x174   :  { %1808 = vmatpush1.bf16.msra.mxu0 %v2663_v28 }
 0x175   :  { %1809 = vmatprep.subr.bf16.mxu0 %v2668_v29 }
 0x178   :  { %1810 = vmatpush1.bf16.msra.mxu0 %v2666_v30 }
 0x1c4   :  { %v1577_v35 = vpop.f32.mrb[4].mxu1 }
 0x1c5   :  { %v3590_v37 = vadd.f32 %v1577_v35, %v970_v32  ;;  %v1579_v38 = vpop.f32.mrb[5].mxu1 }
 0x1c6   :  { %v3592_v40 = vadd.f32 %v1579_v38, %v974_v34  ;;  %v1581_v42 = vpop.f32.mrb[6].mxu1 }
 0x1c7   :  { %v1590_v43 = vmul.f32 0.70710677, %v3590_v37  ;;  %v3595_v44 = vadd.f32 %v1581_v42, %v970_v32  ;;  %v1583_v45 = vpop.f32.mrb[7].mxu1  ;;  %v1586_v61 = vmul.f32 0.5, %v3590_v37  ;;  %v963_v32 = vld [vmem:[%s3779_s12] sm:$0x3] }
 0x1c8   :  { %v1591_v46 = vmul.f32 0.70710677, %v3592_v40  ;;  %v3598_v47 = vadd.f32 %v1583_v45, %v974_v34  ;;  %v1587_v58 = vmul.f32 0.5, %v3592_v40 }
 0x1c9   :  { %2677 = verf.f32 %v1590_v43  ;;  %v1592_v48 = vmul.f32 0.70710677, %v3595_v44  ;;  %v1588_v56 = vmul.f32 0.5, %v3595_v44  ;;  %v1612_v43 = vrot.slane %v963_v32, %v3467_v23 }
 0x1ca   :  { %2679 = verf.f32 %v1591_v46  ;;  %v1593_v49 = vmul.f32 0.70710677, %v3598_v47  ;;  %v1589_v59 = vmul.f32 0.5, %v3598_v47 }
 0x1cb   :  { %2681 = verf.f32 %v1592_v48  ;;  %v1616_v48 = vrot.slane %v963_v32, %v3472_v25 }
 0x1cc   :  { %2683 = verf.f32 %v1593_v49 }
 0x1d3   :  { %v2678_v50 = vpop.eup %2677 }
 0x1d4   :  { %v2680_v51 = vpop.eup %2679  ;;  %v1598_v55 = vadd.f32 1.0, %v2678_v50 }
 0x1d5   :  { %v2682_v52 = vpop.eup %2681  ;;  %v1599_v53 = vadd.f32 1.0, %v2680_v51 }
 0x1d6   :  { %v2684_v54 = vpop.eup %2683  ;;  %v1600_v57 = vadd.f32 1.0, %v2682_v52  ;;  %v1602_v1 = vmul.f32 %v1598_v55, %v1586_v61  ;;  %v156_v61 = vld [vmem:[%s3774_s7] sm:$0x3] }
 0x1d7   :  { %v1601_v60 = vadd.f32 1.0, %v2684_v54  ;;  %v1603_v63 = vmul.f32 %v1599_v53, %v1587_v58 }
 0x1d8   :  { %v1604_v62 = vmul.f32 %v1600_v57, %v1588_v56 }
 0x1d9   :  { %v1605_v0 = vmul.f32 %v1601_v60, %v1589_v59 }
 0x1da   :  { %v1606_v3 = vpack.c.bf16 %v1604_v62, %v1602_v1 }
 0x1db   :  { %v1607_v2 = vpack.c.bf16 %v1605_v0, %v1603_v63  ;;  %v157_v0 = vld [vmem:[%s3775_s8] sm:$0x3] }
 0x1dc   :  { %v805_v4 = vrot.slane %v157_v0, %v3467_v23 }
 0x1dd   :  { %1811 = vmatprep.mubr.bf16.mxu0 %v1607_v2  ;;  %v790_v2 = vrot.slane %v156_v61, %v3467_v23 }
 0x1de   :  { %1812 = vmatmul.mubr.bf16.vlgmr.msra.gmra.mrb[8].mxu0 %v1606_v3 }
 0x20e   :  { %v736_v7 = vpop.f32.mrb[4].mxu0 }
 0x20f   :  { %v737_v8 = vadd.f32 %v736_v7, %v535_v5  ;;  %v738_v9 = vpop.f32.mrb[5].mxu0 }
 0x210   :  { %v739_v10 = vadd.f32 %v738_v9, %v539_v6  ;;  %v740_v11 = vpop.f32.mrb[6].mxu0  ;;  %v809_v9 = vrot.slane %v157_v0, %v3472_v25 }
 0x211   :  { %v3612_v12 = vadd.f32 %v737_v8, %v3476_v33  ;;  %v741_v13 = vadd.f32 %v740_v11, %v535_v5  ;;  %v742_v14 = vpop.f32.mrb[7].mxu0 }
 0x212   :  { %v3615_v15 = vadd.f32 %v739_v10, %v3478_v36  ;;  %v743_v16 = vadd.f32 %v742_v14, %v539_v6 }
 0x213   :  { %v3618_v17 = vadd.f32 %v741_v13, %v3481_v39  ;;  %v758_v39 = vmul.f32 %v3612_v12, %v3612_v12 }
 0x214   :  { %v3621_v18 = vadd.f32 %v743_v16, %v3484_v41  ;;  %v749_v19 = vadd.f32 %v3615_v15, %v3612_v12  ;;  %v759_v41 = vmul.f32 %v3615_v15, %v3615_v15 }
 0x215   :  { %v760_v20 = vmul.f32 %v3618_v17, %v3618_v17 }
 0x216   :  { %750 = vadd.xlane.f32.xlu0 %v749_v19  ;;  %v761_v33 = vmul.f32 %v3621_v18, %v3621_v18  ;;  %v752_v36 = vadd.f32 %v3621_v18, %v3618_v17  ;;  %v762_v22 = vadd.f32 %v759_v41, %v758_v39 }
 0x218   :  { %v765_v21 = vadd.f32 %v761_v33, %v760_v20 }
 0x21a   :  { %766 = vadd.xlane.f32.xlu1 %v765_v21  ;;  %753 = vadd.xlane.f32.xlu0 %v752_v36 }
 0x21e   :  { %763 = vadd.xlane.f32.xlu0 %v762_v22 }
 0x2a3   :  { %v751_v24 = vpop.xlane.xlu0 %750 }
 0x2a4   :  { %v756_v28 = vmul.f32 0.00390625, %v751_v24 }
 0x2a6   :  { %v770_v38 = vmul.f32 %v756_v28, %v756_v28  ;;  %v774_v10 = vsub.f32 %v3612_v12, %v756_v28  ;;  %v775_v11 = vsub.f32 %v3615_v15, %v756_v28 }
 0x2a7   :  { %v767_v26 = vpop.xlane.xlu1 %766  ;;  %v754_v27 = vpop.xlane.xlu0 %753 }
 0x2a8   :  { %v757_v29 = vmul.f32 0.00390625, %v754_v27  ;;  %v769_v30 = vmul.f32 0.00390625, %v767_v26 }
 0x2aa   :  { %v771_v31 = vmul.f32 %v757_v29, %v757_v29  ;;  %v777_v3 = vsub.f32 %v3621_v18, %v757_v29 }
 0x2ab   :  { %v764_v34 = vpop.xlane.xlu0 %763 }
 0x2ac   :  { %v773_v35 = vsub.f32 %v769_v30, %v771_v31  ;;  %v768_v42 = vmul.f32 0.00390625, %v764_v34  ;;  %v3689_v30 = vld [vmem:[%s3782_s15] sm:$0x3] }
 0x2ad   :  { %v1996_v31 = vrot.slane %v3689_v30, %v3472_v25 }
 0x2ae   :  { %v779_v45 = vadd.f32 1e-05, %v773_v35  ;;  %v772_v46 = vsub.f32 %v768_v42, %v770_v38 }
 0x2af   :  { %2063 = vmatprep.mubr.f32.mxu0 %v1996_v31 }
 0x2b0   :  { %2685 = vrsqrt.f32 %v779_v45  ;;  %v778_v49 = vadd.f32 1e-05, %v772_v46 }
 0x2b1   :  { %v1813_v50 = vpop.f32.mrb[8].mxu0 }
 0x2b2   :  { %v1814_v51 = vadd.f32 %v1813_v50, %v1612_v43  ;;  %v1815_v52 = vpop.f32.mrb[9].mxu0  ;;  %2687 = vrsqrt.f32 %v778_v49 }
 0x2b3   :  { %v1816_v53 = vadd.f32 %v1815_v52, %v1616_v48  ;;  %v1817_v54 = vpop.f32.mrb[10].mxu0 }
 0x2b4   :  { %v3641_v55 = vadd.f32 %v3590_v37, %v1814_v51  ;;  %v1818_v56 = vadd.f32 %v1817_v54, %v1612_v43  ;;  %v1819_v57 = vpop.f32.mrb[11].mxu0 }
 0x2b5   :  { %v3644_v58 = vadd.f32 %v3592_v40, %v1816_v53  ;;  %v1820_v59 = vadd.f32 %v1819_v57, %v1616_v48  ;;  %v964_v57 = vld [vmem:[%s3780_s13] sm:$0x3]  ;;  %s2767_s13 = smov [#allocation2]  }
 0x2b6   :  { %v1834_v60 = vmul.f32 %v3641_v55, %v3641_v55  ;;  %v3652_v62 = vadd.f32 %v3595_v44, %v1818_v56  ;;  %v776_v44 = vsub.f32 %v3618_v17, %v757_v29  ;;  %v1866_v0 = vrot.slane %v964_v57, %v3467_v23 }
 0x2b7   :  { %v3655_v63 = vadd.f32 %v3598_v47, %v1820_v59  ;;  %v1826_v37 = vadd.f32 %v3644_v58, %v3641_v55  ;;  %v1835_v40 = vmul.f32 %v3644_v58, %v3644_v58  ;;  %v794_v47 = vrot.slane %v156_v61, %v3472_v25 }
 0x2b8   :  { %v1836_v7 = vmul.f32 %v3652_v62, %v3652_v62 }
 0x2b9   :  { %1827 = vadd.xlane.f32.xlu1 %v1826_v37  ;;  %v1838_v1 = vadd.f32 %v1835_v40, %v1834_v60  ;;  %v1829_v6 = vadd.f32 %v3655_v63, %v3652_v62  ;;  %v1837_v8 = vmul.f32 %v3655_v63, %v3655_v63 }
 0x2ba   :  { %v2686_v5 = vpop.eup %2685 }
 0x2bb   :  { %1839 = vadd.xlane.f32.xlu0 %v1838_v1  ;;  %v784_v13 = vmul.f32 %v2686_v5, %v776_v44  ;;  %v785_v14 = vmul.f32 %v2686_v5, %v777_v3  ;;  %v1841_v33 = vadd.f32 %v1837_v8, %v1836_v7  ;;  %v1870_v1 = vrot.slane %v964_v57, %v3472_v25  ;;  %v965_v44 = vld [vmem:[%s3781_s14] sm:$0x3]  ;;  %s2077_s14 = sshll.u32 %s2767_s13, 4  ;;  %s2078_s14 = int_to_ptr.vmem [resolvable:$true] %s2077_s14 }
 0x2bc   :  { %v2688_v16 = vpop.eup %2687  ;;  %v1881_v5 = vrot.slane %v965_v44, %v3467_v23  ;;  %s2697_s26 = scalar_lea.vmem %s2078_s14, 16  ;;  %s2701_s4 = scalar_lea.vmem %s2078_s14, 32 }
 0x2bd   :  { %1830 = vadd.xlane.f32.xlu1 %v1829_v6  ;;  %v799_v17 = vmul.f32 %v790_v2, %v784_v13  ;;  %v800_v18 = vmul.f32 %v794_v47, %v785_v14  ;;  %v782_v19 = vmul.f32 %v2688_v16, %v774_v10  ;;  %v783_v20 = vmul.f32 %v2688_v16, %v775_v11  ;;  %p2698_p0 = scmp.ne.s32.totalorder %s2078_s14, %s2697_s26  ;;  %p2702_p1 = scmp.lt.s32.totalorder %s2078_s14, %s2078_s14 }
 0x2be   :  { %p2703_p2 = scmp.lt.s32.totalorder %s2701_s4, %s2697_s26 }
 0x2bf   :  { %v3678_v21 = vadd.f32 %v805_v4, %v799_v17  ;;  %v3680_v36 = vadd.f32 %v809_v9, %v800_v18  ;;  %v797_v39 = vmul.f32 %v790_v2, %v782_v19  ;;  %v798_v41 = vmul.f32 %v794_v47, %v783_v20 }
 0x2c0   :  { %p2704_p3 = por %p2703_p2, %p2702_p1 }
 0x2c1   :  { %1842 = vadd.xlane.f32.xlu1 %v1841_v33  ;;  %v1917_v12 = vmul.f32 %v3678_v21, %v3678_v21  ;;  %v1918_v15 = vmul.f32 %v3680_v36, %v3680_v36  ;;  %v812_v22 = vadd.f32 %v805_v4, %v797_v39  ;;  %v813_v24 = vadd.f32 %v809_v9, %v798_v41 }
 0x2c2   :  { %p2705_p4 = pnand %p2704_p3, %p2698_p0 }
 0x2c3   :  { %v1922_v26 = vadd.f32 %v1918_v15, %v1917_v12  ;;  %v1915_v27 = vmul.f32 %v812_v22, %v812_v22  ;;  %v1916_v28 = vmul.f32 %v813_v24, %v813_v24 }
 0x2c5   :  { %1923 = vadd.xlane.f32.xlu0 %v1922_v26  ;;  %v1919_v29 = vadd.f32 %v1916_v28, %v1915_v27 }
 0x2c9   :  { %1920 = vadd.xlane.f32.xlu0 %v1919_v29 }
 0x346   :  { %v1828_v32 = vpop.xlane.xlu1 %1827 }
 0x347   :  { %v1832_v34 = vmul.f32 0.00390625, %v1828_v32 }
 0x348   :  { %v1840_v35 = vpop.xlane.xlu0 %1839 }
 0x349   :  { %v1846_v38 = vmul.f32 %v1832_v34, %v1832_v34  ;;  %v1844_v42 = vmul.f32 0.00390625, %v1840_v35  ;;  %v1850_v60 = vsub.f32 %v3641_v55, %v1832_v34  ;;  %v1851_v61 = vsub.f32 %v3644_v58, %v1832_v34 }
 0x34a   :  { %v1831_v43 = vpop.xlane.xlu1 %1830  ;;  %v1885_v55 = vrot.slane %v965_v44, %v3472_v25 }
 0x34b   :  { %v1848_v45 = vsub.f32 %v1844_v42, %v1846_v38  ;;  %v1833_v46 = vmul.f32 0.00390625, %v1831_v43 }
 0x34d   :  { %v1854_v48 = vadd.f32 1e-05, %v1848_v45  ;;  %v1847_v50 = vmul.f32 %v1833_v46, %v1833_v46  ;;  %v1852_v7 = vsub.f32 %v3652_v62, %v1833_v46  ;;  %v1853_v8 = vsub.f32 %v3655_v63, %v1833_v46 }
 0x34e   :  { %v1843_v49 = vpop.xlane.xlu1 %1842 }
 0x34f   :  { %2689 = vrsqrt.f32 %v1854_v48  ;;  %v1845_v51 = vmul.f32 0.00390625, %v1843_v49 }
 0x351   :  { %v1849_v52 = vsub.f32 %v1845_v51, %v1847_v50 }
 0x352   :  { %v3693_v54 = vpop.xlane.xlu0 %1923 }
 0x353   :  { %v1855_v53 = vadd.f32 1e-05, %v1849_v52  ;;  %v1954_v56 = vmul.f32 0.0, %v3693_v54 }
 0x355   :  { %2691 = vrsqrt.f32 %v1855_v53 }
 0x356   :  { %v3699_v59 = vpop.xlane.xlu0 %1920 }
 0x357   :  { %v1955_v37 = vadd.f32 %v1954_v56, %v3699_v59 }
 0x359   :  { %v2690_v40 = vpop.eup %2689  ;;  %v1956_v2 = vrot.slane %v1955_v37, 4 }
 0x35a   :  { %v1858_v3 = vmul.f32 %v2690_v40, %v1850_v60  ;;  %v1859_v47 = vmul.f32 %v2690_v40, %v1851_v61 }
 0x35b   :  { %v1957_v4 = vadd.f32 %v1956_v2, %v1955_v37 }
 0x35c   :  { %v1873_v58 = vmul.f32 %v1866_v0, %v1858_v3  ;;  %v1874_v6 = vmul.f32 %v1870_v1, %v1859_v47 }
 0x35d   :  { %v1958_v9 = vrot.slane %v1957_v4, 2 }
 0x35e   :  { %v1888_v14 = vadd.f32 %v1881_v5, %v1873_v58  ;;  %v1889_v16 = vadd.f32 %v1885_v55, %v1874_v6 }
 0x35f   :  { %v2692_v10 = vpop.eup %2691  ;;  %v1959_v17 = vadd.f32 %v1958_v9, %v1957_v4 }
 0x360   :  { %v1860_v11 = vmul.f32 %v2692_v10, %v1852_v7  ;;  %v1861_v13 = vmul.f32 %v2692_v10, %v1853_v8  ;;  %v1905_v25 = vmul.f32 %v1888_v14, %v812_v22  ;;  %v1906_v41 = vmul.f32 %v1889_v16, %v813_v24 }
 0x361   :  { %v1960_v20 = vrot.slane %v1959_v17, 1  ;;  %v1925_v27 = vmul.f32 %v1888_v14, %v1888_v14  ;;  %v1926_v28 = vmul.f32 %v1889_v16, %v1889_v16  ;;  %v1992_v24 = vrot.slane %v3689_v30, %v3467_v23 }
 0x362   :  { %v1875_v18 = vmul.f32 %v1866_v0, %v1860_v11  ;;  %v1876_v19 = vmul.f32 %v1870_v1, %v1861_v13 }
 0x363   :  { %v1961_v12 = vadd.f32 %v1960_v20, %v1959_v17  ;;  %v1929_v22 = vadd.f32 %v1926_v28, %v1925_v27 }
 0x364   :  { %v1890_v33 = vadd.f32 %v1881_v5, %v1875_v18  ;;  %v1891_v39 = vadd.f32 %v1885_v55, %v1876_v19 }
 0x365   :  { %1963 = vst.msk [vmem:[#allocation2] sm:$0x1] %vm1962_vm1, %v1961_v12 }
 0x366   :  { %v1927_v15 = vmul.f32 %v1890_v33, %v1890_v33  ;;  %v1928_v62 = vmul.f32 %v1891_v39, %v1891_v39  ;;  %v1907_v63 = vmul.f32 %v1890_v33, %v3678_v21  ;;  %v1908_v26 = vmul.f32 %v1891_v39, %v3680_v36 }
 0x367   :  { %v1909_v21 = vadd.f32 %v1906_v41, %v1905_v25 }
 0x368   :  { %v1932_v29 = vadd.f32 %v1928_v62, %v1927_v15  ;;  %v1912_v31 = vadd.f32 %v1908_v26, %v1907_v63  ;;  %v2329_v32 = vpack.c.bf16 %v1907_v63, %v1905_v25  ;;  %v2327_v34 = vpack.c.bf16 %v1908_v26, %v1906_v41 }
 0x36a   :  { %1933 = vadd.xlane.f32.xlu1 %v1932_v29  ;;  %1913 = vadd.xlane.f32.xlu0 %v1912_v31 }
 0x36b   :  { %2328 = vmatprep.subr.bf16.mxu0 %v2327_v34 }
 0x36c   :  { %2330 = vmatpush1.bf16.xpose.msra.mxu0 %v2329_v32 }
 0x36e   :  { %1930 = vadd.xlane.f32.xlu1 %v1929_v22 }
 0x372   :  { %1910 = vadd.xlane.f32.xlu1 %v1909_v21 }
 0x373   :  { %2064 = vmatmul.mubr.f32.vlgmr.msra.gmra.mrb[12].mxu0 %v1992_v24 }
 0x374   :  { %2708 = shalt.err (!%p2705_p4)
}
 0x375   :  { %s2709_s28 = scalar_lea.hbm %s3783_s16, 16 }
 0x376   :  { %p2710_p5 = scmp.ne.s32.totalorder %s3783_s16, %s2709_s28  ;;  %p2713_p6 = scmp.lt.u32.totalorder %s2709_s28, %s3783_s16 }
 0x378   :  { %p2715_p7 = pnand %p2713_p6, %p2710_p5 }
 0x37a   :  { %2718 = shalt.err (!%p2715_p7)
}
 0x37b   :  { %2080 = dma.vmem_to_hbm [thread:$0]  %s2078_s14, 16, %s3783_s16, [#allocation3]  }
 0x37c   :  { %s2768_s10 = smov [#allocation4]   ;;  %s3798_s23 = sld [smem:[#allocation11_spill]] }
 0x37d   :  { %s2087_s11 = sshll.u32 %s2768_s10, 4  ;;  %s2088_s11 = int_to_ptr.vmem [resolvable:$true] %s2087_s11 }
 0x37e   :  { %s2719_s12 = scalar_lea.vmem %s2088_s11, 16  ;;  %s2723_s5 = scalar_lea.vmem %s2088_s11, 32 }
 0x37f   :  { %p2720_p8 = scmp.ne.s32.totalorder %s2088_s11, %s2719_s12  ;;  %p2724_p9 = scmp.lt.s32.totalorder %s2088_s11, %s2088_s11 }
 0x380   :  { %p2725_p10 = scmp.lt.s32.totalorder %s2723_s5, %s2719_s12 }
 0x382   :  { %p2726_p11 = por %p2725_p10, %p2724_p9 }
 0x384   :  { %p2727_p12 = pnand %p2726_p11, %p2720_p8 }
 0x3f7   :  { %v1934_v23 = vpop.xlane.xlu1 %1933  ;;  %v1914_v52 = vpop.xlane.xlu0 %1913 }
 0x3f8   :  { %v1936_v36 = vmul.f32 %v1934_v23, %v3693_v54  ;;  %v1965_v35 = vmul.f32 0.0, %v1934_v23 }
 0x3fa   :  { %v1938_v30 = vmax.f32 %v1936_v36, 1e-12 }
 0x3fb   :  { %v1931_v38 = vpop.xlane.xlu1 %1930 }
 0x3fc   :  { %2693 = vrsqrt.f32 %v1938_v30  ;;  %v1935_v42 = vmul.f32 %v1931_v38, %v3699_v59  ;;  %v1966_v43 = vadd.f32 %v1965_v35, %v1931_v38  ;;  %v1948_v59 = vld [vmem:[%s3798_s23 + $0x8] sm:$0xff] }
 0x3fe   :  { %v1937_v45 = vmax.f32 %v1935_v42, 1e-12  ;;  %v1967_v46 = vrot.slane %v1966_v43, 4 }
 0x3ff   :  { %v1911_v61 = vpop.xlane.xlu1 %1910 }
 0x400   :  { %2695 = vrsqrt.f32 %v1937_v45  ;;  %v1968_v48 = vadd.f32 %v1967_v46, %v1966_v43 }
 0x402   :  { %v1969_v49 = vrot.slane %v1968_v48, 2 }
 0x404   :  { %v1970_v50 = vadd.f32 %v1969_v49, %v1968_v48 }
 0x406   :  { %v2694_v51 = vpop.eup %2693  ;;  %v1971_v53 = vrot.slane %v1970_v50, 1 }
 0x407   :  { %v1942_v56 = vmul.f32 %v2694_v51, %v1914_v52 }
 0x408   :  { %v1972_v54 = vadd.f32 %v1971_v53, %v1970_v50 }
 0x409   :  { %v1944_v57 = vadd.f32 1.0, %v1942_v56 }
 0x40a   :  { %v2696_v60 = vpop.eup %2695  ;;  %1973 = vst.msk [vmem:[#allocation4] sm:$0x1] %vm1962_vm1, %v1972_v54 }
 0x40b   :  { %v1946_v37 = vmul.f32 0.5, %v1944_v57  ;;  %v1941_v40 = vmul.f32 %v2696_v60, %v1911_v61 }
 0x40c   :  { %2730 = shalt.err (!%p2727_p12)
}
 0x40d   :  { %s2731_s7 = scalar_lea.hbm %s3784_s17, 16 }
 0x40e   :  { %p2732_p13 = scmp.ne.s32.totalorder %s3784_s17, %s2731_s7  ;;  %p2735_p0 = scmp.lt.u32.totalorder %s2731_s7, %s3784_s17 }
 0x410   :  { %p2737_p1 = pnand %p2735_p0, %p2732_p13 }
 0x412   :  { %2740 = shalt.err (!%p2737_p1)
}
 0x413   :  { %2090 = dma.vmem_to_hbm [thread:$0]  %s2088_s11, 16, %s3784_s17, [#allocation5]   ;;  %v1950_v0 = vsub.f32 %v1946_v37, %v1948_v59  ;;  %v1943_v1 = vadd.f32 1.0, %v1941_v40  ;;  %v1947_v2 = vld [vmem:[%s3798_s23] sm:$0xff]  ;;  %vm1976_vm2 = vcmask 7168  }
 0x414   :  { %s2769_s17 = smov [#allocation6]  }
 0x415   :  { %v1952_v44 = vmul.f32 0.0, %v1950_v0  ;;  %v1945_v3 = vmul.f32 0.5, %v1943_v1  ;;  %s2097_s4 = sshll.u32 %s2769_s17, 4  ;;  %s2098_s4 = int_to_ptr.vmem [resolvable:$true] %s2097_s4 }
 0x416   :  { %s2741_s2 = scalar_lea.vmem %s2098_s4, 16  ;;  %s2745_s27 = scalar_lea.vmem %s2098_s4, 32 }
 0x417   :  { %v1975_v47 = vmul.f32 %v1952_v44, %v1952_v44  ;;  %v1949_v4 = vsub.f32 %v1945_v3, %v1947_v2  ;;  %p2742_p2 = scmp.ne.s32.totalorder %s2098_s4, %s2741_s2  ;;  %p2746_p3 = scmp.lt.s32.totalorder %s2098_s4, %s2098_s4 }
 0x418   :  { %p2747_p4 = scmp.lt.s32.totalorder %s2745_s27, %s2741_s2 }
 0x419   :  { %v1974_v5 = vmul.f32 %v1949_v4, %v1949_v4  ;;  %v1978_v55 = vsel %vm1976_vm2, %v1975_v47, 0.0 }
 0x41a   :  { %p2748_p5 = por %p2747_p4, %p2746_p3 }
 0x41b   :  { %v1977_v58 = vsel %vm1976_vm2, %v1974_v5, 0.0 }
 0x41c   :  { %v1979_v6 = vadd.f32 %v1978_v55, %v1977_v58  ;;  %p2749_p6 = pnand %p2748_p5, %p2742_p2 }
 0x41e   :  { %v1980_v7 = vrot.slane %v1979_v6, 4 }
 0x420   :  { %v1981_v8 = vadd.f32 %v1980_v7, %v1979_v6 }
 0x422   :  { %v1982_v9 = vrot.slane %v1981_v8, 2 }
 0x424   :  { %v1983_v10 = vadd.f32 %v1982_v9, %v1981_v8 }
 0x426   :  { %v1984_v11 = vrot.slane %v1983_v10, 1 }
 0x428   :  { %v1985_v13 = vadd.f32 %v1984_v11, %v1983_v10 }
 0x42a   :  { %1986 = vst.msk [vmem:[#allocation6] sm:$0x1] %vm1962_vm1, %v1985_v13 }
 0x42b   :  { %2752 = shalt.err (!%p2749_p6)
}
 0x42c   :  { %s2753_s0 = scalar_lea.hbm %s3785_s18, 16 }
 0x42d   :  { %p2754_p7 = scmp.ne.s32.totalorder %s3785_s18, %s2753_s0  ;;  %p2757_p8 = scmp.lt.u32.totalorder %s2753_s0, %s3785_s18 }
 0x42f   :  { %p2759_p9 = pnand %p2757_p8, %p2754_p7 }
 0x431   :  { %2762 = shalt.err (!%p2759_p9)
}
 0x432   :  { %2100 = dma.vmem_to_hbm [thread:$0]  %s2098_s4, 16, %s3785_s18, [#allocation5]   ;;  %vm2069_vm3 = vcmask 122880  }
 0x446   :  { %v2065_v14 = vpop.f32.mrb[12].mxu0 }
 0x447   :  { %2070 = vst.msk [vmem:[%s3786_s19] sm:$0x1] %vm2069_vm3, %v2065_v14  ;;  %v2067_v16 = vpop.f32.mrb[13].mxu0 }
 0x448   :  { %2763 = dma.done.wait [#allocation3], 16  }
 0x449   :  { %2764 = vsyncadd [#allocation3], 4294967280 }
 0x44a   :  { %2765 = dma.done.wait [#allocation5], 32  }
 0x44b   :  { %2766 = vsyncadd [#allocation5], 4294967264 }
 0x44c   :  { %2114 = vsyncpa [#allocation3], 1 }
 0x44d   :  { %2115 = vsyncpa [#allocation5], 1 }

</bundles_post_ra>
